<compile_context>
chip_gen: v7x
topology: tpu7x:2x2x1
jax: 0.10.0
libtpu: 0.0.40
codegen_flags: <defaults>
</compile_context>

<pallas_src>
import functools
import math

import jax
import jax.numpy as jnp
from jax.experimental import pallas as pl
from jax.experimental.pallas import tpu as pltpu


_VMEM_LIMIT_BYTES = 64 * 1024 * 1024  # sized for v7x (64 MiB physical VMEM); v5e/v6e have 128 MiB


# ----------------------------------------------------------------------------- kernels

def _fused_matmul_kernel(*refs, act, has_res, has_gate):
    """acc += x @ w along the K grid axis; at the last K step apply
         y = act((acc [+ residual]) * scale + shift)
         [ y = xfeat * gate + y ]        (fused SE-gate multiply + skip add)
       and store y."""
    it = iter(refs)
    x_ref = next(it)
    w_ref = next(it)
    r_ref = next(it) if has_res else None
    scale_ref = next(it)
    shift_ref = next(it)
    xf_ref = next(it) if has_gate else None
    g_ref = next(it) if has_gate else None
    o_ref = next(it)
    acc_ref = next(it)

    k = pl.program_id(1)

    @pl.when(k == 0)
    def _():
        acc_ref[...] = jnp.zeros_like(acc_ref)

    acc_ref[...] += jnp.dot(x_ref[...], w_ref[...],
                            preferred_element_type=jnp.float32)

    @pl.when(k == pl.num_programs(1) - 1)
    def _():
        acc = acc_ref[...]
        if has_res:
            acc = acc + r_ref[...]
        y = acc * scale_ref[...] + shift_ref[...]
        if act == "relu":
            y = jnp.maximum(y, 0.0)
        elif act == "sigmoid":
            y = jax.nn.sigmoid(y)
        if has_gate:
            y = xf_ref[...] * g_ref[0] + y
        o_ref[...] = y.astype(o_ref.dtype)


def _avgpool_kernel(x_ref, o_ref, acc_ref, *, inv_n):
    """Pipelined global average pool over the HW axis with a resident VMEM accumulator."""
    @pl.when(pl.program_id(0) == 0)
    def _():
        acc_ref[...] = jnp.zeros_like(acc_ref)

    acc_ref[...] += jnp.sum(x_ref[...], axis=1, keepdims=True)

    @pl.when(pl.program_id(0) == pl.num_programs(0) - 1)
    def _():
        o_ref[...] = (acc_ref[...] * inv_n).astype(o_ref.dtype)


def _se_mlp_kernel(p_ref, w1_ref, b1_ref, w2_ref, b2_ref, o_ref):
    """Whole FFCSE MLP in one kernel: gate = sigmoid(relu(pooled @ w1 + b1) @ w2 + b2)."""
    h = jnp.dot(p_ref[...], w1_ref[...], preferred_element_type=jnp.float32) + b1_ref[...]
    h = jnp.maximum(h, 0.0)
    g = jnp.dot(h, w2_ref[...], preferred_element_type=jnp.float32) + b2_ref[...]
    o_ref[...] = jax.nn.sigmoid(g).astype(o_ref.dtype)


# ----------------------------------------------------------------------------- wrappers

def _pick_row_tile(m, group=None):
    """Largest row tile (from a fixed candidate list) dividing m (and `group` if given).
    Prefer a tile giving >= 2 grid steps so both v7x TensorCores get work."""
    cands = [t for t in (1024, 512, 256, 128, 64, 32, 16, 8)
             if m % t == 0 and (group is None or group % t == 0)]
    if not cands:
        return m
    best = cands[0]
    if m // best < 2:
        for t in cands:
            if m // t >= 2:
                return t
    return best


def _pick_k_tile(k):
    if k <= 1024:
        return k
    for t in (512, 256, 128):
        if k % t == 0:
            return t
    return k


def matmul_bn_act(x, w, scale, shift, *, act="none", residual=None,
                  gate=None, xfeat=None, rows_per_batch=None):
    """y = act((x @ w [+ residual]) * scale + shift) [; y = xfeat * gate + y].

    x:(M,K) bf16, w:(K,N) bf16 (MXU native); residual/xfeat:(M,N) f32; gate:(B,N) f32 with
    `rows_per_batch` rows of x per batch element; scale/shift:(N,) f32.  Output (M,N) f32."""
    M, K = x.shape
    N = w.shape[1]
    has_res = residual is not None
    has_gate = gate is not None
    tm = _pick_row_tile(M, rows_per_batch if has_gate else None)
    tk = _pick_k_tile(K)
    nm, nk = M // tm, K // tk

    in_specs = [pl.BlockSpec((tm, tk), lambda i, k: (i, k)),
                pl.BlockSpec((tk, N), lambda i, k: (k, 0))]
    args = [x, w]
    if has_res:
        in_specs.append(pl.BlockSpec((tm, N), lambda i, k: (i, 0)))
        args.append(residual.astype(jnp.float32))
    in_specs += [pl.BlockSpec((1, N), lambda i, k: (0, 0)),
                 pl.BlockSpec((1, N), lambda i, k: (0, 0))]
    args += [scale.reshape(1, N).astype(jnp.float32),
             shift.reshape(1, N).astype(jnp.float32)]
    if has_gate:
        assert xfeat is not None and rows_per_batch is not None
        assert rows_per_batch % tm == 0, "row tile must not straddle a batch boundary"
        rpb = rows_per_batch
        in_specs += [pl.BlockSpec((tm, N), lambda i, k: (i, 0)),
                     pl.BlockSpec((1, 1, N), lambda i, k: ((i * tm) // rpb, 0, 0))]
        args += [xfeat.astype(jnp.float32),
                 gate.reshape(-1, 1, N).astype(jnp.float32)]

    kernel = functools.partial(_fused_matmul_kernel, act=act,
                               has_res=has_res, has_gate=has_gate)
    return pl.pallas_call(
        kernel,
        out_shape=jax.ShapeDtypeStruct((M, N), jnp.float32),
        grid=(nm, nk),
        in_specs=in_specs,
        out_specs=pl.BlockSpec((tm, N), lambda i, k: (i, 0)),
        scratch_shapes=[pltpu.VMEM((tm, N), jnp.float32)],
        compiler_params=pltpu.CompilerParams(
            dimension_semantics=("parallel", "arbitrary"),
            vmem_limit_bytes=_VMEM_LIMIT_BYTES),
    )(*args)


def global_avg_pool(x):
    """x: (B, HW, C) f32 -> (B, C) via a tiled, pipelined in-kernel reduction."""
    B, HW, C = x.shape
    t = _pick_row_tile(HW)
    out = pl.pallas_call(
        functools.partial(_avgpool_kernel, inv_n=1.0 / HW),
        out_shape=jax.ShapeDtypeStruct((B, 1, C), jnp.float32),
        grid=(HW // t,),
        in_specs=[pl.BlockSpec((B, t, C), lambda i: (0, i, 0))],
        out_specs=pl.BlockSpec((B, 1, C), lambda i: (0, 0, 0)),
        scratch_shapes=[pltpu.VMEM((B, 1, C), jnp.float32)],
        compiler_params=pltpu.CompilerParams(
            dimension_semantics=("arbitrary",),
            vmem_limit_bytes=_VMEM_LIMIT_BYTES),
    )(x)
    return out[:, 0, :]


def se_gate(x_feat, se):
    """FFCSE_block gate: x_feat (B, HW, C) f32 -> per-channel sigmoid gate (B, C) f32."""
    pooled = global_avg_pool(x_feat)                                   # (B, C)
    B, C = pooled.shape
    return pl.pallas_call(
        _se_mlp_kernel,
        out_shape=jax.ShapeDtypeStruct((B, C), jnp.float32),
    )(pooled, se["w1"], se["b1"], se["w2"], se["b2"])


# ----------------------------------------------------------------------------- glue helpers

def im2col_3x3(x):
    """x: (B,H,W,C) -> (B*H*W, 9*C) patches for a 3x3 / pad=1 conv (zero padding), dtype-preserving."""
    B, H, W, C = x.shape
    xp = jnp.pad(x, ((0, 0), (1, 1), (1, 1), (0, 0)))
    patches = [xp[:, dy:dy + H, dx:dx + W, :] for dy in range(3) for dx in range(3)]
    p = jnp.stack(patches, axis=3)              # (B, H, W, 9, C)
    return p.reshape(B * H * W, 9 * C)


def spectral_transform(x_g, sp):
    """SpectralTransform(enable_lfu=False, stride=1).  x_g:(B,H,W,in_cg) f32 -> (B*H*W, out_cg) f32."""
    B, H, W, cg = x_g.shape
    M = B * H * W
    # conv1 (1x1) + BN + ReLU (fused Pallas matmul, bf16 operands)
    x1 = matmul_bn_act(x_g.reshape(M, cg).astype(jnp.bfloat16),
                       sp["w1"], sp["bn1_scale"], sp["bn1_shift"], act="relu")
    c2 = x1.shape[1]
    xs = x1.reshape(B, H, W, c2)
    # FourierUnit: rfft2(ortho) -> 1x1 conv on (re,im) interleaved channels + BN + ReLU -> irfft2(ortho)
    f = jnp.fft.rfft2(xs, axes=(1, 2), norm="ortho")                   # (B, H, W//2+1, c2) complex
    W2 = f.shape[2]
    fr = jnp.stack([jnp.real(f), jnp.imag(f)], axis=-1).reshape(B, H, W2, 2 * c2)
    y = matmul_bn_act(fr.reshape(B * H * W2, 2 * c2).astype(jnp.bfloat16),
                      sp["w_fu"], sp["bn_fu_scale"], sp["bn_fu_shift"], act="relu")
    y = y.reshape(B, H, W2, c2, 2)
    comp = y[..., 0] + 1j * y[..., 1]
    fu_out = jnp.fft.irfft2(comp, s=(H, W), axes=(1, 2), norm="ortho").reshape(M, c2)
    # conv2 (1x1, no BN/act) on (x1 + fourier_output)
    z = (x1 + fu_out).astype(jnp.bfloat16)
    return matmul_bn_act(z, sp["w2"], sp["ones"], sp["zeros"], act="none")


def ffc_bn_act(x_l, x_g, p, *, relu, ksize, gate=None, xfeat=None):
    """Fused FFC_BN_ACT: ONE lane-dense matmul produces [local | global] output channels.

    Local cols:  conv([x_l;x_g], [W_l2l;W_g2l]);  global cols: conv(x_l, W_l2g) + SpectralTransform(x_g)
    (spectral result enters through the kernel's residual input, zero-padded over local cols).
    Optional SE-gate epilogue (skip branch): out = xfeat * gate + bn_act_result."""
    B, H, W, _ = x_l.shape
    M = B * H * W
    x_cat = jnp.concatenate([x_l, x_g], axis=-1).astype(jnp.bfloat16)
    if ksize == 3:
        X = im2col_3x3(x_cat)                                         # (M, 9*C_in) bf16
    else:
        X = x_cat.reshape(M, x_cat.shape[-1])                         # (M, C_in) bf16
    spec = spectral_transform(x_g, p["spec"])                         # (M, out_cg) f32
    residual = jnp.pad(spec, ((0, 0), (p["out_cl"], 0)))              # zeros over local columns
    y = matmul_bn_act(X, p["w_all"], p["bn_scale"], p["bn_shift"],
                      act="relu" if relu else "none", residual=residual,
                      gate=gate, xfeat=xfeat,
                      rows_per_batch=H * W if gate is not None else None)
    return y.reshape(B, H, W, y.shape[-1])


# ----------------------------------------------------------------------------- parameters

class KeyGen:
    def __init__(self, seed):
        self.key = jax.random.PRNGKey(seed)

    def __call__(self):
        self.key, sub = jax.random.split(self.key)
        return sub


def _conv_w(kg, o, i, k):
    return jax.random.normal(kg(), (o, i, k, k), jnp.float32) / math.sqrt(i * k * k)


def _conv_mat(w):
    # torch layout (O, I, kh, kw) -> matmul layout (kh*kw*I, O), matching im2col (tap-major) ordering
    o, i, kh, kw = w.shape
    return jnp.transpose(w, (2, 3, 1, 0)).reshape(kh * kw * i, o)


def _bn(kg, n, eps=1e-5):
    gamma = 1.0 + 0.1 * jax.random.normal(kg(), (n,), jnp.float32)
    beta = 0.1 * jax.random.normal(kg(), (n,), jnp.float32)
    mean = 0.1 * jax.random.normal(kg(), (n,), jnp.float32)
    var = 1.0 + 0.1 * jnp.abs(jax.random.normal(kg(), (n,), jnp.float32))
    scale = gamma / jnp.sqrt(var + eps)
    shift = beta - mean * scale
    return scale, shift


def make_ffc_params(kg, c_in, c_out, ksize, ratio_gin=0.5, ratio_gout=0.5):
    in_cg = int(c_in * ratio_gin)
    in_cl = c_in - in_cg
    out_cg = int(c_out * ratio_gout)
    out_cl = c_out - out_cg

    w_l2l = _conv_w(kg, out_cl, in_cl, ksize)
    w_g2l = _conv_w(kg, out_cl, in_cg, ksize)
    w_l2g = _conv_w(kg, out_cg, in_cl, ksize)
    # One lane-dense combined weight over [x_l;x_g] -> [local | global] outputs; the direct
    # g->g path does not exist (it is the SpectralTransform), so those rows are zero.
    w_local = jnp.concatenate([w_l2l, w_g2l], axis=1)                          # (out_cl, c_in, k, k)
    w_global = jnp.concatenate(
        [w_l2g, jnp.zeros((out_cg, in_cg, ksize, ksize), jnp.float32)], axis=1)  # (out_cg, c_in, k, k)
    w_full = jnp.concatenate([w_local, w_global], axis=0)                       # (c_out, c_in, k, k)

    bn_l = _bn(kg, out_cl)
    bn_g = _bn(kg, out_cg)

    cg2 = out_cg // 2
    sp_w1 = _conv_w(kg, cg2, in_cg, 1)
    sp_bn1 = _bn(kg, cg2)
    fu_w = _conv_w(kg, 2 * cg2, 2 * cg2, 1)
    fu_bn = _bn(kg, 2 * cg2)
    sp_w2 = _conv_w(kg, out_cg, cg2, 1)
    spec = dict(
        w1=_conv_mat(sp_w1).astype(jnp.bfloat16), bn1_scale=sp_bn1[0], bn1_shift=sp_bn1[1],
        w_fu=_conv_mat(fu_w).astype(jnp.bfloat16), bn_fu_scale=fu_bn[0], bn_fu_shift=fu_bn[1],
        w2=_conv_mat(sp_w2).astype(jnp.bfloat16),
        ones=jnp.ones((out_cg,), jnp.float32), zeros=jnp.zeros((out_cg,), jnp.float32),
    )
    return dict(out_cl=out_cl, out_cg=out_cg,
                w_all=_conv_mat(w_full).astype(jnp.bfloat16),
                bn_scale=jnp.concatenate([bn_l[0], bn_g[0]]),
                bn_shift=jnp.concatenate([bn_l[1], bn_g[1]]),
                spec=spec)


def make_se_params(kg, channels, ratio_g=0.5):
    in_cg = int(channels * ratio_g)
    in_cl = channels - in_cg
    r = channels // 16
    assert r >= 1, "FFCSE_block requires channels >= 16"
    w1 = _conv_w(kg, r, channels, 1)
    b1 = 0.1 * jax.random.normal(kg(), (r,), jnp.float32)
    w_a2l = _conv_w(kg, in_cl, r, 1)
    b_a2l = 0.1 * jax.random.normal(kg(), (in_cl,), jnp.float32)
    w_a2g = _conv_w(kg, in_cg, r, 1)
    b_a2g = 0.1 * jax.random.normal(kg(), (in_cg,), jnp.float32)
    # a2l / a2g 1x1 convs fused into one (r, channels) matmul; whole SE MLP runs in one kernel.
    return dict(w1=_conv_mat(w1), b1=b1.reshape(1, r),
                w2=jnp.concatenate([_conv_mat(w_a2l), _conv_mat(w_a2g)], axis=1),
                b2=jnp.concatenate([b_a2l, b_a2g]).reshape(1, channels))


def make_ffc_decode_block_params(seed, in_channel, out_channel, ratio=0.5):
    kg = KeyGen(seed)
    return dict(
        in_cg=int(in_channel * ratio),
        cba1=make_ffc_params(kg, in_channel, in_channel, 3, ratio, ratio),
        cba2=make_ffc_params(kg, in_channel, out_channel, 3, ratio, ratio),
        cba3=make_ffc_params(kg, in_channel, out_channel, 1, ratio, ratio),
        se=make_se_params(kg, out_channel, ratio),
    )


# ----------------------------------------------------------------------------- forward

def ffc_decode_block_forward(x_nchw, params, upsample=True):
    """FFCDecodeBlock.forward.  x_nchw: (B, C_in, H, W) f32 -> (B, C_out, 2H, 2W) f32."""
    B, C_in, H, W = x_nchw.shape
    if upsample:
        # nn.Upsample(scale_factor=2, mode='bilinear') default align_corners=False (half-pixel)
        x_nchw = jax.image.resize(x_nchw, (B, C_in, 2 * H, 2 * W), method="bilinear")
        H, W = 2 * H, 2 * W
    x = jnp.transpose(x_nchw, (0, 2, 3, 1)).astype(jnp.float32)       # NHWC

    in_cg = params["in_cg"]
    in_cl = C_in - in_cg
    x_l, x_g = x[..., :in_cl], x[..., in_cl:]
    skip_l, skip_g = x_l, x_g

    # conv_bn_act1 / conv_bn_act2 (3x3, pad 1, ReLU) — one fused lane-dense matmul each
    y1 = ffc_bn_act(x_l, x_g, params["cba1"], relu=True, ksize=3)     # (B,H,W,C_in)
    cl1 = params["cba1"]["out_cl"]
    y2 = ffc_bn_act(y1[..., :cl1], y1[..., cl1:], params["cba2"], relu=True, ksize=3)  # (B,H,W,C_out)
    C_out = y2.shape[-1]

    # FFCSE_block gate (pipelined avg-pool + single-kernel SE MLP)
    gate = se_gate(y2.reshape(B, H * W, C_out), params["se"])         # (B, C_out)

    # conv_bn_act3 (1x1 skip conv, Identity act) fused with the final  x*gate + skip  epilogue
    out = ffc_bn_act(skip_l, skip_g, params["cba3"], relu=False, ksize=1,
                     gate=gate, xfeat=y2.reshape(B * H * W, C_out))   # (B,H,W,C_out)
    return jnp.transpose(out, (0, 3, 1, 2))                           # back to NCHW


# ----------------------------------------------------------------------------- main

if __name__ == "__main__":
    B, C_in, C_out, H, W = 2, 32, 32, 16, 16
    x = jax.random.normal(jax.random.PRNGKey(0), (B, C_in, H, W), jnp.float32)
    params = make_ffc_decode_block_params(seed=0, in_channel=C_in, out_channel=C_out)

    out = ffc_decode_block_forward(x, params, upsample=True)
    out = jax.block_until_ready(out)

    assert out.shape == (B, C_out, 2 * H, 2 * W), out.shape
    assert out.dtype == jnp.float32
    assert bool(jnp.all(jnp.isfinite(out)))
    print("KERNEL_OK")
</pallas_src>

<mosaic_0001>
module attributes {stable_mosaic.version = 11 : i64} {
  func.func @_fused_matmul_kernel(%arg0: i32, %arg1: i32, %arg2: memref<1024x16xbf16, #tpu.memory_space<vmem>>, %arg3: memref<16x8xbf16, #tpu.memory_space<vmem>>, %arg4: memref<1x8xf32, #tpu.memory_space<vmem>>, %arg5: memref<1x8xf32, #tpu.memory_space<vmem>>, %arg6: memref<1024x8xf32, #tpu.memory_space<vmem>>, %arg7: memref<1024x8xf32, #tpu.memory_space<vmem>>) attributes {dimension_semantics = [#tpu.dimension_semantics<parallel>, #tpu.dimension_semantics<arbitrary>], iteration_bounds = array<i64: 2, 1>, scalar_prefetch = 0 : i64, scratch_operands = 1 : i64, tpu.core_type = #tpu.core_type<tc>, window_params = [{transform_indices = @transform_0, window_bounds = array<i64: 1024, 16>}, {transform_indices = @transform_1, window_bounds = array<i64: 16, 8>}, {pipeline_mode = #tpu.pipeline_mode<synchronous>, transform_indices = @transform_2, window_bounds = array<i64: 1, 8>}, {pipeline_mode = #tpu.pipeline_mode<synchronous>, transform_indices = @transform_3, window_bounds = array<i64: 1, 8>}, {transform_indices = @transform_4, window_bounds = array<i64: 1024, 8>}]} {
    %c0_i32 = arith.constant 0 : i32
    %0 = arith.cmpi eq, %arg1, %c0_i32 : i32
    %1 = arith.extui %0 : i1 to i32
    %c0_i32_0 = arith.constant 0 : i32
    %2 = arith.cmpi ne, %1, %c0_i32_0 : i32
    scf.if %2 {
      %cst_10 = arith.constant 0.000000e+00 : f32
      %12 = vector.broadcast %cst_10 : f32 to vector<1024x8xf32>
      %c0_11 = arith.constant 0 : index
      %c0_12 = arith.constant 0 : index
      %13 = vector.load %arg7[%c0_11, %c0_12] : memref<1024x8xf32, #tpu.memory_space<vmem>>, vector<1024x8xf32>
      tpu.vector_store %arg7[%c0_11, %c0_12], %12 {strides = array<i32>} : memref<1024x8xf32, #tpu.memory_space<vmem>>, vector<1024x8xf32>,
    } else {
    }
    %c0 = arith.constant 0 : index
    %c0_1 = arith.constant 0 : index
    %3 = vector.load %arg7[%c0, %c0_1] : memref<1024x8xf32, #tpu.memory_space<vmem>>, vector<1024x8xf32>
    %c0_2 = arith.constant 0 : index
    %c0_3 = arith.constant 0 : index
    %4 = vector.load %arg2[%c0_2, %c0_3] : memref<1024x16xbf16, #tpu.memory_space<vmem>>, vector<1024x16xbf16>
    %c0_4 = arith.constant 0 : index
    %c0_5 = arith.constant 0 : index
    %5 = vector.load %arg3[%c0_4, %c0_5] : memref<16x8xbf16, #tpu.memory_space<vmem>>, vector<16x8xbf16>
    %cst = arith.constant dense<0.000000e+00> : vector<1024x8xf32>
    %6 = tpu.matmul %4, %5, %cst {dimension_numbers = #tpu.dot_dimension_numbers<[1], [0], [0], [1], [0, 0, 1, 1], [], []>} : vector<1024x16xbf16>, vector<16x8xbf16>, vector<1024x8xf32> -> vector<1024x8xf32>
    %7 = arith.addf %3, %6 : vector<1024x8xf32>
    %c0_6 = arith.constant 0 : index
    %c0_7 = arith.constant 0 : index
    %8 = vector.load %arg7[%c0_6, %c0_7] : memref<1024x8xf32, #tpu.memory_space<vmem>>, vector<1024x8xf32>
    tpu.vector_store %arg7[%c0_6, %c0_7], %7 {strides = array<i32>} : memref<1024x8xf32, #tpu.memory_space<vmem>>, vector<1024x8xf32>,
    %c0_i32_8 = arith.constant 0 : i32
    %9 = arith.cmpi eq, %arg1, %c0_i32_8 : i32
    %10 = arith.extui %9 : i1 to i32
    %c0_i32_9 = arith.constant 0 : i32
    %11 = arith.cmpi ne, %10, %c0_i32_9 : i32
    scf.if %11 {
      %c0_10 = arith.constant 0 : index
      %c0_11 = arith.constant 0 : index
      %12 = vector.load %arg7[%c0_10, %c0_11] : memref<1024x8xf32, #tpu.memory_space<vmem>>, vector<1024x8xf32>
      %c0_12 = arith.constant 0 : index
      %c0_13 = arith.constant 0 : index
      %13 = vector.load %arg4[%c0_12, %c0_13] : memref<1x8xf32, #tpu.memory_space<vmem>>, vector<1x8xf32>
      %14 = vector.broadcast %13 : vector<1x8xf32> to vector<1024x8xf32>
      %15 = arith.mulf %12, %14 : vector<1024x8xf32>
      %c0_14 = arith.constant 0 : index
      %c0_15 = arith.constant 0 : index
      %16 = vector.load %arg5[%c0_14, %c0_15] : memref<1x8xf32, #tpu.memory_space<vmem>>, vector<1x8xf32>
      %17 = vector.broadcast %16 : vector<1x8xf32> to vector<1024x8xf32>
      %18 = arith.addf %15, %17 : vector<1024x8xf32>
      %cst_16 = arith.constant 0.000000e+00 : f32
      %19 = vector.broadcast %cst_16 : f32 to vector<1024x8xf32>
      %20 = arith.maximumf %18, %19 : vector<1024x8xf32>
      %c0_17 = arith.constant 0 : index
      %c0_18 = arith.constant 0 : index
      %21 = vector.load %arg6[%c0_17, %c0_18] : memref<1024x8xf32, #tpu.memory_space<vmem>>, vector<1024x8xf32>
      tpu.vector_store %arg6[%c0_17, %c0_18], %20 {strides = array<i32>} : memref<1024x8xf32, #tpu.memory_space<vmem>>, vector<1024x8xf32>,
    } else {
    }
    return
  }
  func.func @transform_0(%arg0: i32, %arg1: i32) -> (i32, i32) {
    %c0_i32 = arith.constant 0 : i32
    return %arg0, %arg1 : i32, i32
  }
  func.func @transform_1(%arg0: i32, %arg1: i32) -> (i32, i32) {
    %c0_i32 = arith.constant 0 : i32
    %c0_i32_0 = arith.constant 0 : i32
    return %arg1, %c0_i32 : i32, i32
  }
  func.func @transform_2(%arg0: i32, %arg1: i32) -> (i32, i32) {
    %c0_i32 = arith.constant 0 : i32
    %c0_i32_0 = arith.constant 0 : i32
    %c0_i32_1 = arith.constant 0 : i32
    return %c0_i32, %c0_i32_0 : i32, i32
  }
  func.func @transform_3(%arg0: i32, %arg1: i32) -> (i32, i32) {
    %c0_i32 = arith.constant 0 : i32
    %c0_i32_0 = arith.constant 0 : i32
    %c0_i32_1 = arith.constant 0 : i32
    return %c0_i32, %c0_i32_0 : i32, i32
  }
  func.func @transform_4(%arg0: i32, %arg1: i32) -> (i32, i32) {
    %c0_i32 = arith.constant 0 : i32
    %c0_i32_0 = arith.constant 0 : i32
    return %arg0, %c0_i32 : i32, i32
  }
}

</mosaic_0001>

<bundles_post_ra>
// kernel: tpu_custom_call.1
= control target key start
LH: loop header
LB: loop body
LE: loop exit
PB: predicated region body
PF: predicated region fallthrough
CT: control target
= control target key end

     0   :  { %9 = vsyncpa [#allocation4], 0  ;;  %s4854_s0 = inlined_call_operand.hbm [shape: bf16[2048,16], index: 0, kind: input, shape index: {}]   ;;  %s4855_s1 = inlined_call_operand.hbm [shape: bf16[16,8], index: 1, kind: input, shape index: {}]   ;;  %s4856_s2 = inlined_call_operand.hbm [shape: f32[1,8], index: 2, kind: input, shape index: {}]   ;;  %s4857_s3 = inlined_call_operand.hbm [shape: f32[1,8], index: 3, kind: input, shape index: {}]   ;;  %s4858_s4 = inlined_call_operand.hbm [shape: f32[2048,8], index: 4, kind: output, shape index: {}]  }
   0x1   :  { %11 = vsyncpa [#allocation4 + $0x1], 0 }
   0x2   :  { %12 = vsyncpa [#allocation7], 0 }
   0x3   :  { %13 = vsyncpa [#allocation10], 0 }
   0x4   :  { %14 = vsyncpa [#allocation5], 0 }
   0x5   :  { %16 = vsyncpa [#allocation5 + $0x1], 0  ;;  %s3539_s15 = smov 0   ;;  %s3541_s16 = smov 0  }
   0x6   :  { %s3543_s17 = smov 0   ;;  %s3545_s18 = smov 0  }
   0x7   :  { %s3547_s19 = smov 0   ;;  %s3549_s20 = smov 0  }
   0x8 LB: > { %s2780_s21 = sadd.s32 4294967295, %s3502_s20   ;;  %s2781_s22 = sadd.s32 4294967294, %s3502_s20   ;;  %s3502_s20 = sphi %s3549_s20, %s22_s20   ;;  %s3498_s19 = sphi %s3547_s19, %s4885_s19   ;;  %s3494_s18 = sphi %s3545_s18, %s4884_s18   ;;  %s3490_s17 = sphi %s3543_s17, %s4883_s17   ;;  %s3486_s16 = sphi %s3541_s16, %s4882_s16   ;;  %s3482_s15 = sphi %s3539_s15, %s4881_s15  }
   0x9   : > { %p56_p0 = scmp.ne.s32.totalorder %s3486_s16, %s3482_s15  ;;  %p3573_p1 = scmp.eq.s32.totalorder %s2780_s21, 0 }
   0xa   : > { %p3577_p2 = scmp.eq.s32.totalorder %s2780_s21, 1  ;;  %p154_p3 = scmp.eq.s32.totalorder %s2781_s22, 1 }
   0xb   : > { %s4864_s23 = scalar_select %p3573_p1, 1, 0 }
   0xc   : > { %s4865_s24 = scalar_select %p3577_p2, 1, 0 }
   0xd   : > { %p3583_p4 = por %p3573_p1, %p56_p0  ;;  %p2782_p5 = scmp.ge.s32.totalorder %s3502_s20, 1 }
   0xe   : > { %p3588_p6 = por %p154_p3, %p56_p0  ;;  %p161_p7 = scmp.lt.s32.totalorder %s3502_s20, 3 }
   0xf   : > { %s4866_s25 = scalar_select %p3583_p4, 1, 0 }
  0x10   : > { %s4867_s26 = scalar_select %p3588_p6, 1, 0 }
  0x11   : > { %p3593_p8 = pnand %p2782_p5, %p161_p7  ;;  %s3504_s28 = smov [#allocation6]  }
  0x12   : > { %4868 = sst [smem:[#allocation16_spill]] %s4867_s26  ;;  %s176_s29 = sshll.u32 %s3504_s28, 4  ;;  %s3597_s29 = int_to_ptr.vmem [resolvable:$true] %s176_s29 }
  0x13   : > { %s4869_s27 = scalar_select %p3593_p8, 1, 0 }
  0x14   : > { %p3147_p9 = pneg %p3593_p8  ;;  %s3505_s5 = smov [#allocation8]  }
  0x15   : > { %s190_s6 = sshll.u32 %s3505_s5, 4  ;;  %s3506_s7 = smov [#allocation9]   ;;  %s3608_s6 = int_to_ptr.vmem [resolvable:$true] %s190_s6 }
  0x16   : > { %p3604_p11 = pnand %p3147_p9, %p3573_p1  ;;  %s3610_s8 = sshll.u32 %s3506_s7, 4  ;;  %s202_s8 = int_to_ptr.vmem [resolvable:$true] %s3610_s8 }
  0x17   : > { %s3298_s11 = scalar_lea.hbm %s4855_s1, 128 }
  0x18   : > { %p3299_p12 = scmp.ne.s32.totalorder %s4855_s1, %s3298_s11  ;;  %p3620_p13 = pneg %p3604_p11 }
  0x19   : > { %p3305_p5 = scmp.lt.u32.totalorder %s3298_s11, %s4855_s1 }
  0x1a   : > { %p3301_p0 = pnand %p3620_p13, %p3299_p12 }
  0x1c   : > { %p3302_p3 = pneg %p3301_p0 }
  0x1e   : > { %p3307_p7 = pnand %p3305_p5, %p3302_p3 }
  0x20   : > { %3310 = shalt.err (!%p3307_p7)
}
  0x21   : > { %s3311_s28 = scalar_lea.vmem %s3597_s29, 128  ;;  %p3319_p1 = scmp.lt.s32.totalorder %s3597_s29, %s3597_s29 }
  0x22   : > { %p3312_p9 = scmp.ne.s32.totalorder %s3597_s29, %s3311_s28  ;;  %p3320_p4 = scmp.lt.s32.totalorder %s3311_s28, %s3311_s28 }
  0x24   : > { %p3314_p10 = pnand %p3312_p9, %p3620_p13  ;;  %p3321_p12 = por %p3320_p4, %p3319_p1 }
  0x26   : > { %p3315_p6 = pneg %p3314_p10 }
  0x28   : > { %p3322_p0 = pnand %p3321_p12, %p3315_p6 }
  0x2a   : > { %3325 = shalt.err (!%p3322_p0)
}
  0x2b   : > { %s3507_s5 = smov 64   ;;  %s3508_s7 = smov 4  }
  0x2c   : > { %3150 = dma.hbm_to_vmem [thread:$0]  (!%p3604_p11), %s4855_s1, 128, %s3597_s29, [#allocation7], %s3507_s5, %s3507_s5, %s3508_s7  }
  0x2d   : > { %s3326_s13 = scalar_lea.hbm %s4856_s2, 16 }
  0x2e   : > { %p3327_p1 = scmp.ne.s32.totalorder %s4856_s2, %s3326_s13  ;;  %p3333_p10 = scmp.lt.u32.totalorder %s3326_s13, %s4856_s2 }
  0x30   : > { %p3329_p4 = pnand %p3327_p1, %p3620_p13 }
  0x32   : > { %p3330_p6 = pneg %p3329_p4 }
  0x34   : > { %p3335_p3 = pnand %p3333_p10, %p3330_p6 }
  0x36   : > { %3338 = shalt.err (!%p3335_p3)
}
  0x37   : > { %s3339_s29 = scalar_lea.vmem %s3608_s6, 16  ;;  %s3346_s9 = scalar_lea.vmem %s3608_s6, 32 }
  0x38   : > { %p3340_p5 = scmp.ne.s32.totalorder %s3608_s6, %s3339_s29  ;;  %p3347_p12 = scmp.lt.s32.totalorder %s3608_s6, %s3608_s6 }
  0x39   : > { %p3348_p0 = scmp.lt.s32.totalorder %s3346_s9, %s3339_s29 }
  0x3a   : > { %p3342_p7 = pnand %p3340_p5, %p3620_p13 }
  0x3b   : > { %p3349_p1 = por %p3348_p0, %p3347_p12 }
  0x3c   : > { %p3343_p9 = pneg %p3342_p7 }
  0x3e   : > { %p3350_p4 = pnand %p3349_p1, %p3343_p9 }
  0x40   : > { %3353 = shalt.err (!%p3350_p4)
}
  0x41   : > { %3153 = dma.hbm_to_vmem [thread:$0]  (!%p3604_p11), %s4856_s2, 16, %s3608_s6, [#allocation7]  }
  0x42   : > { %s3354_s13 = scalar_lea.hbm %s4857_s3, 16 }
  0x43   : > { %p3355_p6 = scmp.ne.s32.totalorder %s4857_s3, %s3354_s13  ;;  %p3361_p5 = scmp.lt.u32.totalorder %s3354_s13, %s4857_s3 }
  0x45   : > { %p3357_p10 = pnand %p3355_p6, %p3620_p13 }
  0x47   : > { %p3358_p3 = pneg %p3357_p10 }
  0x49   : > { %p3363_p7 = pnand %p3361_p5, %p3358_p3 }
  0x4b   : > { %3366 = shalt.err (!%p3363_p7)
}
  0x4c   : > { %s3367_s9 = scalar_lea.vmem %s202_s8, 16  ;;  %s3374_s6 = scalar_lea.vmem %s202_s8, 32 }
  0x4d   : > { %p3368_p9 = scmp.ne.s32.totalorder %s202_s8, %s3367_s9  ;;  %p3375_p1 = scmp.lt.s32.totalorder %s202_s8, %s202_s8 }
  0x4e   : > { %p3376_p4 = scmp.lt.s32.totalorder %s3374_s6, %s3367_s9 }
  0x4f   : > { %p3370_p12 = pnand %p3368_p9, %p3620_p13 }
  0x50   : > { %p3377_p8 = por %p3376_p4, %p3375_p1 }
  0x51   : > { %p3371_p0 = pneg %p3370_p12 }
  0x53   : > { %p3378_p2 = pnand %p3377_p8, %p3371_p0 }
  0x55   : > { %3381 = shalt.err (!%p3378_p2)
}
  0x56   : > { %3156 = dma.hbm_to_vmem [thread:$0]  (!%p3604_p11), %s4857_s3, 16, %s202_s8, [#allocation10]  }
  0x57   : > { %s43_s14 = sadd.s32 1, %s3490_s17  ;;  %s34_s11 = sadd.s32 1, %s3498_s19 }
  0x58   : > { %p50_p2 = scmp.ne.s32.totalorder %s3490_s17, %s3486_s16  ;;  %p36_p8 = scmp.ge.s32.totalorder %s34_s11, 2 }
  0x59   : > { %p51_p13 = scmp.eq.s32.totalorder %s3502_s20, 0  ;;  %p4872_p6 = scmp.ne.s32.totalorder %s4865_s24, 0 }
  0x5a   : > { %p3168_p3 = scmp.lt.s32.totalorder %s3502_s20, 2  ;;  %s4887_s11 = smov (%p36_p8, %s34_s11), 0 }
  0x5b   : > { %p3694_p10 = por %p4872_p6, %p50_p2  ;;  %p52_p5 = por %p51_p13, %p50_p2 }
  0x5c   : > { %s212_s12 = sand.u32 1, %s3490_s17   ;;  %s38_s13 = ssub.s32 %s3498_s19, %s4887_s11 }
  0x5d   : > { %p41_p7 = scmp.eq.s32.totalorder %s38_s13, 0  ;;  %s2787_s8 = sshll.u32 %s212_s12, 9 }
  0x5e   : > { %s2932_s21 = sshll.u32 %s3498_s19, 13  ;;  %s216_s9 = scalar_lea.vmem [#allocation3], %s2787_s8 }
  0x5f   : > { %s3706_s22 = scalar_select %p41_p7, %s3490_s17, %s43_s14  }
  0x60   : > { %s3711_s24 = scalar_lea.hbm %s4854_s0, %s2932_s21  ;;  %s224_s6 = sshll.u32 %s216_s9, 4  ;;  %s3713_s6 = int_to_ptr.vmem [resolvable:$true] %s224_s6 }
  0x61   : > { %p3717_p11 = pnand %p3168_p3, %p52_p5  ;;  %s3721_s10 = scalar_lea.sflag [#allocation4], %s212_s12 }
  0x62   : > { %s3382_s14 = scalar_lea.hbm %s3711_s24, 8192  ;;  %s3387_s21 = scalar_lea.hbm %s4854_s0, 16384 }
  0x63   : > { %p3383_p9 = scmp.ne.s32.totalorder %s3711_s24, %s3382_s14  ;;  %p3384_p12 = pneg %p3717_p11 }
  0x64   : > { %p3388_p4 = scmp.lt.u32.totalorder %s3711_s24, %s4854_s0  ;;  %p3389_p2 = scmp.lt.u32.totalorder %s3387_s21, %s3382_s14 }
  0x65   : > { %p3385_p0 = pnand %p3384_p12, %p3383_p9  ;;  %p3391_p13 = scmp.lt.u32.totalorder %s3382_s14, %s3711_s24 }
  0x66   : > { %p3390_p8 = por %p3389_p2, %p3388_p4 }
  0x67   : > { %p3386_p1 = pneg %p3385_p0 }
  0x68   : > { %p3392_p6 = por %p3391_p13, %p3390_p8 }
  0x6a   : > { %p3393_p3 = pnand %p3392_p6, %p3386_p1 }
  0x6c   : > { %3396 = shalt.err (!%p3393_p3)
}
  0x6d   : > { %s3397_s12 = scalar_lea.vmem %s3713_s6, 8192  ;;  %s3509_s9 = smov [#allocation3]  }
  0x6e   : > { %p3398_p5 = scmp.ne.s32.totalorder %s3713_s6, %s3397_s12  ;;  %s3402_s13 = sshll.u32 %s3509_s9, 4  ;;  %s3403_s13 = int_to_ptr.vmem [resolvable:$false] %s3402_s13 }
  0x6f   : > { %s3404_s8 = scalar_lea.vmem %s3403_s13, 16384  ;;  %p3405_p0 = scmp.lt.s32.totalorder %s3713_s6, %s3403_s13 }
  0x70   : > { %p3400_p7 = pnand %p3398_p5, %p3384_p12  ;;  %p3406_p4 = scmp.lt.s32.totalorder %s3404_s8, %s3397_s12 }
  0x72   : > { %p3401_p9 = pneg %p3400_p7  ;;  %p3407_p2 = por %p3406_p4, %p3405_p0 }
  0x74   : > { %p3408_p8 = pnand %p3407_p2, %p3401_p9 }
  0x76   : > { %3411 = shalt.err (!%p3408_p8)
}
  0x77   : > { %3160 = dma.hbm_to_vmem [thread:$0]  (!%p3717_p11), %s3711_s24, 8192, %s3713_s6, %s3721_s10, %s3507_s5, %s3507_s5, %s3508_s7  }
  0x78   : > { %p4875_p12 = scmp.ne.s32.totalorder %s4869_s27, 0 }
  0x79   : > { %s3755_s14 = sand.u32 (!%p4875_p12), 1, %s3486_s16   ;;  %p4876_p1 = scmp.ne.s32.totalorder (!%p4875_p12), %s4866_s25, 0 }
  0x7a   : > { %236 = sbr.rel (%p4875_p12) target bundleno = 522 (0x20a), region = 36  ;;  %s2791_s21 = sshll.u32 (!%p4875_p12), %s3755_s14, 9 }
  0x7b   : > { %s239_s28 = scalar_lea.sflag (!%p4875_p12), [#allocation4], %s3755_s14  ;;  %s3759_s29 = scalar_lea.vmem (!%p4875_p12), [#allocation3], %s2791_s21 }
  0x81   : > { %3465 = dma.done.wait (%p4876_p1), %s239_s28, 8192  }
  0x82   : > { %3467 = vsyncadd (%p4876_p1), %s239_s28, 4294959104  ;;  %p4877_p11 = scmp.ne.s32.totalorder %s4864_s23, 0 }
  0x84   : > { %3469 = dma.done.wait (%p4877_p11), [#allocation7], 144  }
  0x85   : > { %3471 = vsyncadd (%p4877_p11), [#allocation7], 4294967152 }
  0x86   : > { %3473 = dma.done.wait (%p4877_p11), [#allocation10], 16  }
  0x87   : > { %3475 = vsyncadd (%p4877_p11), [#allocation10], 4294967280  ;;  %vm287_vm0 = vcmask 64512   ;;  %v3510_v0 = vmov 0.0   ;;  %v3229_v1 = vld [vmem:[#allocation6] sm:$0xff]   ;;  %vm1000_vm1 = vcmask 130048  }
  0x88   : > { %290 = vst.msk [vmem:[#allocation2 + $0x10] sm:$0xff] %vm287_vm0, %v3510_v0  ;;  %288 = vst.msk [vmem:[#allocation2] sm:$0xff] %vm287_vm0, %v3510_v0  ;;  %v3230_v2 = vld [vmem:[%s3759_s29] sm:$0xff]   ;;  %2999 = vmatprep.subr.bf16.mxu0 %v3229_v1  ;;  %3129 = vmatprep.subr.bf16.mxu1 %v3229_v1  ;;  %v3232_v4 = vld [vmem:[%s3759_s29 + $0x8] sm:$0xff]   ;;  %s2795_s23 = sshll.u32 %s3755_s14, 10  ;;  %s2933_s27 = sshll.u32 %s3494_s18, 14 }
  0x89   : > { %289 = vst.msk [vmem:[#allocation2 + $0x8] sm:$0xff] %vm287_vm0, %v3510_v0  ;;  %291 = vst.msk [vmem:[#allocation2 + $0x18] sm:$0xff] %vm287_vm0, %v3510_v0  ;;  %v3231_v3 = vld [vmem:[%s3759_s29 + $0x100] sm:$0xff]   ;;  %3000 = vmatpush3.bf16.msra.mxu0 %v3229_v1  ;;  %3130 = vmatpush3.bf16.msra.mxu1 %v3229_v1  ;;  %v3233_v5 = vld [vmem:[%s3759_s29 + $0x108] sm:$0xff]   ;;  %s4196_s25 = scalar_lea.vmem [#allocation11], %s2795_s23  ;;  %s4791_s24 = scalar_lea.hbm %s4858_s4, %s2933_s27 }
  0x8a   : > { %292 = vst.msk [vmem:[#allocation2 + $0x20] sm:$0xff] %vm287_vm0, %v3510_v0  ;;  %293 = vst.msk [vmem:[#allocation2 + $0x28] sm:$0xff] %vm287_vm0, %v3510_v0  ;;  %3001 = vmatprep.mubr.msk.bf16.mxu0 %vm1000_vm1, %v3230_v2  ;;  %3065 = vmatprep.mubr.msk.bf16.mxu1 %vm1000_vm1, %v3231_v3  ;;  %v3234_v6 = vld [vmem:[%s3759_s29 + $0x10] sm:$0xff]   ;;  %v3236_v8 = vld [vmem:[%s3759_s29 + $0x18] sm:$0xff]   ;;  %s2666_s5 = sshll.u32 %s4196_s25, 4  ;;  %s2653_s6 = scalar_lea.sflag [#allocation5], %s3755_s14  ;;  %s4793_s5 = int_to_ptr.vmem [resolvable:$true] %s2666_s5 }
  0x8b   : > { %294 = vst.msk [vmem:[#allocation2 + $0x30] sm:$0xff] %vm287_vm0, %v3510_v0  ;;  %295 = vst.msk [vmem:[#allocation2 + $0x38] sm:$0xff] %vm287_vm0, %v3510_v0  ;;  %v3235_v7 = vld [vmem:[%s3759_s29 + $0x110] sm:$0xff]   ;;  %v3237_v9 = vld [vmem:[%s3759_s29 + $0x118] sm:$0xff]   ;;  %s3412_s26 = scalar_lea.vmem %s4793_s5, 16384  ;;  %s3511_s10 = smov [#allocation11]  }
  0x8c   : > { %296 = vst.msk [vmem:[#allocation2 + $0x40] sm:$0xff] %vm287_vm0, %v3510_v0  ;;  %297 = vst.msk [vmem:[#allocation2 + $0x48] sm:$0xff] %vm287_vm0, %v3510_v0  ;;  %3002 = vmatmul.mubr.msk.bf16.vlgmr.msra.gmra.mrb[0].mxu0 %vm1000_vm1, %v3232_v4  ;;  %3066 = vmatmul.mubr.msk.bf16.vlgmr.msra.gmra.mrb[0].mxu1 %vm1000_vm1, %v3233_v5  ;;  %v3238_v10 = vld [vmem:[%s3759_s29 + $0x20] sm:$0xff]   ;;  %v3240_v12 = vld [vmem:[%s3759_s29 + $0x28] sm:$0xff]   ;;  %p3413_p13 = scmp.ne.s32.totalorder %s4793_s5, %s3412_s26  ;;  %s3416_s12 = sshll.u32 %s3511_s10, 4  ;;  %s3417_s12 = int_to_ptr.vmem [resolvable:$false] %s3416_s12 }
  0x8d   : > { %298 = vst.msk [vmem:[#allocation2 + $0x50] sm:$0xff] %vm287_vm0, %v3510_v0  ;;  %299 = vst.msk [vmem:[#allocation2 + $0x58] sm:$0xff] %vm287_vm0, %v3510_v0  ;;  %3005 = vmatprep.mubr.msk.bf16.mxu0 %vm1000_vm1, %v3234_v6  ;;  %3069 = vmatprep.mubr.msk.bf16.mxu1 %vm1000_vm1, %v3235_v7  ;;  %v3239_v11 = vld [vmem:[%s3759_s29 + $0x120] sm:$0xff]   ;;  %v3241_v13 = vld [vmem:[%s3759_s29 + $0x128] sm:$0xff]   ;;  %s3418_s9 = scalar_lea.vmem %s3417_s12, 32768  ;;  %p3419_p5 = scmp.lt.s32.totalorder %s4793_s5, %s3417_s12 }
  0x8e   : > { %300 = vst.msk [vmem:[#allocation2 + $0x60] sm:$0xff] %vm287_vm0, %v3510_v0  ;;  %301 = vst.msk [vmem:[#allocation2 + $0x68] sm:$0xff] %vm287_vm0, %v3510_v0  ;;  %v3242_v14 = vld [vmem:[%s3759_s29 + $0x30] sm:$0xff]   ;;  %v3244_v16 = vld [vmem:[%s3759_s29 + $0x38] sm:$0xff]   ;;  %p3414_p6 = pnand %p3413_p13, %p3694_p10  ;;  %p3420_p7 = scmp.lt.s32.totalorder %s3418_s9, %s3412_s26 }
  0x8f   : > { %302 = vst.msk [vmem:[#allocation2 + $0x70] sm:$0xff] %vm287_vm0, %v3510_v0  ;;  %303 = vst.msk [vmem:[#allocation2 + $0x78] sm:$0xff] %vm287_vm0, %v3510_v0  ;;  %v3243_v15 = vld [vmem:[%s3759_s29 + $0x130] sm:$0xff]   ;;  %v3245_v17 = vld [vmem:[%s3759_s29 + $0x138] sm:$0xff]  }
  0x90   : > { %304 = vst.msk [vmem:[#allocation2 + $0x80] sm:$0xff] %vm287_vm0, %v3510_v0  ;;  %305 = vst.msk [vmem:[#allocation2 + $0x88] sm:$0xff] %vm287_vm0, %v3510_v0  ;;  %v3246_v18 = vld [vmem:[%s3759_s29 + $0x40] sm:$0xff]   ;;  %v3248_v20 = vld [vmem:[%s3759_s29 + $0x48] sm:$0xff]   ;;  %p3415_p3 = pneg %p3414_p6  ;;  %p3421_p9 = por %p3420_p7, %p3419_p5 }
  0x91   : > { %306 = vst.msk [vmem:[#allocation2 + $0x90] sm:$0xff] %vm287_vm0, %v3510_v0  ;;  %307 = vst.msk [vmem:[#allocation2 + $0x98] sm:$0xff] %vm287_vm0, %v3510_v0  ;;  %v3247_v19 = vld [vmem:[%s3759_s29 + $0x140] sm:$0xff]   ;;  %v3249_v21 = vld [vmem:[%s3759_s29 + $0x148] sm:$0xff]  }
  0x92   : > { %308 = vst.msk [vmem:[#allocation2 + $0xa0] sm:$0xff] %vm287_vm0, %v3510_v0  ;;  %309 = vst.msk [vmem:[#allocation2 + $0xa8] sm:$0xff] %vm287_vm0, %v3510_v0  ;;  %v3250_v22 = vld [vmem:[%s3759_s29 + $0x50] sm:$0xff]   ;;  %v3252_v24 = vld [vmem:[%s3759_s29 + $0x58] sm:$0xff]   ;;  %p3422_p0 = pnand %p3421_p9, %p3415_p3 }
  0x93   : > { %310 = vst.msk [vmem:[#allocation2 + $0xb0] sm:$0xff] %vm287_vm0, %v3510_v0  ;;  %311 = vst.msk [vmem:[#allocation2 + $0xb8] sm:$0xff] %vm287_vm0, %v3510_v0  ;;  %v3251_v23 = vld [vmem:[%s3759_s29 + $0x150] sm:$0xff]   ;;  %v3253_v25 = vld [vmem:[%s3759_s29 + $0x158] sm:$0xff]  }
  0x94   : > { %312 = vst.msk [vmem:[#allocation2 + $0xc0] sm:$0xff] %vm287_vm0, %v3510_v0  ;;  %313 = vst.msk [vmem:[#allocation2 + $0xc8] sm:$0xff] %vm287_vm0, %v3510_v0  ;;  %3006 = vmatmul.mubr.msk.bf16.gmra.mrb[4].mxu0 %vm1000_vm1, %v3236_v8  ;;  %3070 = vmatmul.mubr.msk.bf16.gmra.mrb[4].mxu1 %vm1000_vm1, %v3237_v9  ;;  %v3254_v26 = vld [vmem:[%s3759_s29 + $0x60] sm:$0xff]   ;;  %v3256_v28 = vld [vmem:[%s3759_s29 + $0x68] sm:$0xff]  }
  0x95   : > { %314 = vst.msk [vmem:[#allocation2 + $0xd0] sm:$0xff] %vm287_vm0, %v3510_v0  ;;  %315 = vst.msk [vmem:[#allocation2 + $0xd8] sm:$0xff] %vm287_vm0, %v3510_v0  ;;  %3009 = vmatprep.mubr.msk.bf16.mxu0 %vm1000_vm1, %v3238_v10  ;;  %3073 = vmatprep.mubr.msk.bf16.mxu1 %vm1000_vm1, %v3239_v11  ;;  %v3255_v27 = vld [vmem:[%s3759_s29 + $0x160] sm:$0xff]   ;;  %v3257_v29 = vld [vmem:[%s3759_s29 + $0x168] sm:$0xff]  }
  0x96   : > { %316 = vst.msk [vmem:[#allocation2 + $0xe0] sm:$0xff] %vm287_vm0, %v3510_v0  ;;  %317 = vst.msk [vmem:[#allocation2 + $0xe8] sm:$0xff] %vm287_vm0, %v3510_v0  ;;  %v3258_v30 = vld [vmem:[%s3759_s29 + $0x70] sm:$0xff]   ;;  %v3260_v32 = vld [vmem:[%s3759_s29 + $0x78] sm:$0xff]  }
  0x97   : > { %318 = vst.msk [vmem:[#allocation2 + $0xf0] sm:$0xff] %vm287_vm0, %v3510_v0  ;;  %319 = vst.msk [vmem:[#allocation2 + $0xf8] sm:$0xff] %vm287_vm0, %v3510_v0  ;;  %v3259_v31 = vld [vmem:[%s3759_s29 + $0x170] sm:$0xff]   ;;  %v3261_v33 = vld [vmem:[%s3759_s29 + $0x178] sm:$0xff]  }
  0x98   : > { %320 = vst.msk [vmem:[#allocation2 + $0x100] sm:$0xff] %vm287_vm0, %v3510_v0  ;;  %321 = vst.msk [vmem:[#allocation2 + $0x108] sm:$0xff] %vm287_vm0, %v3510_v0  ;;  %v3262_v34 = vld [vmem:[%s3759_s29 + $0x80] sm:$0xff]   ;;  %v3264_v36 = vld [vmem:[%s3759_s29 + $0x88] sm:$0xff]  }
  0x99   : > { %322 = vst.msk [vmem:[#allocation2 + $0x110] sm:$0xff] %vm287_vm0, %v3510_v0  ;;  %323 = vst.msk [vmem:[#allocation2 + $0x118] sm:$0xff] %vm287_vm0, %v3510_v0  ;;  %v3263_v35 = vld [vmem:[%s3759_s29 + $0x180] sm:$0xff]   ;;  %v3265_v37 = vld [vmem:[%s3759_s29 + $0x188] sm:$0xff]  }
  0x9a   : > { %324 = vst.msk [vmem:[#allocation2 + $0x120] sm:$0xff] %vm287_vm0, %v3510_v0  ;;  %325 = vst.msk [vmem:[#allocation2 + $0x128] sm:$0xff] %vm287_vm0, %v3510_v0  ;;  %v3266_v38 = vld [vmem:[%s3759_s29 + $0x90] sm:$0xff]   ;;  %v3268_v40 = vld [vmem:[%s3759_s29 + $0x98] sm:$0xff]  }
  0x9b   : > { %326 = vst.msk [vmem:[#allocation2 + $0x130] sm:$0xff] %vm287_vm0, %v3510_v0  ;;  %327 = vst.msk [vmem:[#allocation2 + $0x138] sm:$0xff] %vm287_vm0, %v3510_v0  ;;  %v3267_v39 = vld [vmem:[%s3759_s29 + $0x190] sm:$0xff]   ;;  %v3269_v41 = vld [vmem:[%s3759_s29 + $0x198] sm:$0xff]  }
  0x9c   : > { %328 = vst.msk [vmem:[#allocation2 + $0x140] sm:$0xff] %vm287_vm0, %v3510_v0  ;;  %329 = vst.msk [vmem:[#allocation2 + $0x148] sm:$0xff] %vm287_vm0, %v3510_v0  ;;  %3010 = vmatmul.mubr.msk.bf16.gmra.mrb[8].mxu0 %vm1000_vm1, %v3240_v12  ;;  %3074 = vmatmul.mubr.msk.bf16.gmra.mrb[8].mxu1 %vm1000_vm1, %v3241_v13  ;;  %v3270_v42 = vld [vmem:[%s3759_s29 + $0xa0] sm:$0xff]   ;;  %v3272_v44 = vld [vmem:[%s3759_s29 + $0xa8] sm:$0xff]  }
  0x9d   : > { %330 = vst.msk [vmem:[#allocation2 + $0x150] sm:$0xff] %vm287_vm0, %v3510_v0  ;;  %331 = vst.msk [vmem:[#allocation2 + $0x158] sm:$0xff] %vm287_vm0, %v3510_v0  ;;  %3013 = vmatprep.mubr.msk.bf16.mxu0 %vm1000_vm1, %v3242_v14  ;;  %3077 = vmatprep.mubr.msk.bf16.mxu1 %vm1000_vm1, %v3243_v15  ;;  %v3271_v43 = vld [vmem:[%s3759_s29 + $0x1a0] sm:$0xff]   ;;  %v3273_v45 = vld [vmem:[%s3759_s29 + $0x1a8] sm:$0xff]  }
  0x9e   : > { %332 = vst.msk [vmem:[#allocation2 + $0x160] sm:$0xff] %vm287_vm0, %v3510_v0  ;;  %333 = vst.msk [vmem:[#allocation2 + $0x168] sm:$0xff] %vm287_vm0, %v3510_v0  ;;  %v3274_v46 = vld [vmem:[%s3759_s29 + $0xb0] sm:$0xff]   ;;  %v3276_v48 = vld [vmem:[%s3759_s29 + $0xb8] sm:$0xff]  }
  0x9f   : > { %334 = vst.msk [vmem:[#allocation2 + $0x170] sm:$0xff] %vm287_vm0, %v3510_v0  ;;  %335 = vst.msk [vmem:[#allocation2 + $0x178] sm:$0xff] %vm287_vm0, %v3510_v0  ;;  %v3275_v47 = vld [vmem:[%s3759_s29 + $0x1b0] sm:$0xff]   ;;  %v3277_v49 = vld [vmem:[%s3759_s29 + $0x1b8] sm:$0xff]  }
  0xa0   : > { %336 = vst.msk [vmem:[#allocation2 + $0x180] sm:$0xff] %vm287_vm0, %v3510_v0  ;;  %337 = vst.msk [vmem:[#allocation2 + $0x188] sm:$0xff] %vm287_vm0, %v3510_v0  ;;  %v3278_v50 = vld [vmem:[%s3759_s29 + $0xc0] sm:$0xff]   ;;  %v3280_v52 = vld [vmem:[%s3759_s29 + $0xc8] sm:$0xff]  }
  0xa1   : > { %338 = vst.msk [vmem:[#allocation2 + $0x190] sm:$0xff] %vm287_vm0, %v3510_v0  ;;  %339 = vst.msk [vmem:[#allocation2 + $0x198] sm:$0xff] %vm287_vm0, %v3510_v0  ;;  %v3279_v51 = vld [vmem:[%s3759_s29 + $0x1c0] sm:$0xff]   ;;  %v3281_v53 = vld [vmem:[%s3759_s29 + $0x1c8] sm:$0xff]  }
  0xa2   : > { %340 = vst.msk [vmem:[#allocation2 + $0x1a0] sm:$0xff] %vm287_vm0, %v3510_v0  ;;  %341 = vst.msk [vmem:[#allocation2 + $0x1a8] sm:$0xff] %vm287_vm0, %v3510_v0  ;;  %v3282_v54 = vld [vmem:[%s3759_s29 + $0xd0] sm:$0xff]   ;;  %v3284_v56 = vld [vmem:[%s3759_s29 + $0xd8] sm:$0xff]  }
  0xa3   : > { %342 = vst.msk [vmem:[#allocation2 + $0x1b0] sm:$0xff] %vm287_vm0, %v3510_v0  ;;  %343 = vst.msk [vmem:[#allocation2 + $0x1b8] sm:$0xff] %vm287_vm0, %v3510_v0  ;;  %v3283_v55 = vld [vmem:[%s3759_s29 + $0x1d0] sm:$0xff]   ;;  %v3285_v57 = vld [vmem:[%s3759_s29 + $0x1d8] sm:$0xff]  }
  0xa4   : > { %344 = vst.msk [vmem:[#allocation2 + $0x1c0] sm:$0xff] %vm287_vm0, %v3510_v0  ;;  %345 = vst.msk [vmem:[#allocation2 + $0x1c8] sm:$0xff] %vm287_vm0, %v3510_v0  ;;  %3014 = vmatmul.mubr.msk.bf16.gmra.mrb[12].mxu0 %vm1000_vm1, %v3244_v16  ;;  %3078 = vmatmul.mubr.msk.bf16.gmra.mrb[12].mxu1 %vm1000_vm1, %v3245_v17  ;;  %v3286_v58 = vld [vmem:[%s3759_s29 + $0xe0] sm:$0xff]   ;;  %v3288_v60 = vld [vmem:[%s3759_s29 + $0xe8] sm:$0xff]  }
  0xa5   : > { %346 = vst.msk [vmem:[#allocation2 + $0x1d0] sm:$0xff] %vm287_vm0, %v3510_v0  ;;  %347 = vst.msk [vmem:[#allocation2 + $0x1d8] sm:$0xff] %vm287_vm0, %v3510_v0  ;;  %3017 = vmatprep.mubr.msk.bf16.mxu0 %vm1000_vm1, %v3246_v18  ;;  %3081 = vmatprep.mubr.msk.bf16.mxu1 %vm1000_vm1, %v3247_v19  ;;  %v3287_v59 = vld [vmem:[%s3759_s29 + $0x1e0] sm:$0xff]   ;;  %v3289_v61 = vld [vmem:[%s3759_s29 + $0x1e8] sm:$0xff]  }
  0xa6   : > { %348 = vst.msk [vmem:[#allocation2 + $0x1e0] sm:$0xff] %vm287_vm0, %v3510_v0  ;;  %349 = vst.msk [vmem:[#allocation2 + $0x1e8] sm:$0xff] %vm287_vm0, %v3510_v0  ;;  %v3290_v62 = vld [vmem:[%s3759_s29 + $0xf0] sm:$0xff]   ;;  %v3293_v1 = vld [vmem:[%s3759_s29 + $0x1f8] sm:$0xff]  }
  0xa7   : > { %350 = vst.msk [vmem:[#allocation2 + $0x1f0] sm:$0xff] %vm287_vm0, %v3510_v0  ;;  %351 = vst.msk [vmem:[#allocation2 + $0x1f8] sm:$0xff] %vm287_vm0, %v3510_v0  ;;  %v3291_v63 = vld [vmem:[%s3759_s29 + $0x1f0] sm:$0xff]   ;;  %v416_v4 = vld [vmem:[#allocation2] sm:$0xff] }
  0xa8   : > { %352 = vst.msk [vmem:[#allocation2 + $0x200] sm:$0xff] %vm287_vm0, %v3510_v0  ;;  %353 = vst.msk [vmem:[#allocation2 + $0x208] sm:$0xff] %vm287_vm0, %v3510_v0  ;;  %v418_v2 = vld [vmem:[#allocation2 + $0x10] sm:$0xff]  ;;  %v419_v8 = vld [vmem:[#allocation2 + $0x18] sm:$0xff] }
  0xa9   : > { %354 = vst.msk [vmem:[#allocation2 + $0x210] sm:$0xff] %vm287_vm0, %v3510_v0  ;;  %355 = vst.msk [vmem:[#allocation2 + $0x218] sm:$0xff] %vm287_vm0, %v3510_v0  ;;  %v417_v14 = vld [vmem:[#allocation2 + $0x8] sm:$0xff] }
  0xaa   : > { %356 = vst.msk [vmem:[#allocation2 + $0x220] sm:$0xff] %vm287_vm0, %v3510_v0  ;;  %357 = vst.msk [vmem:[#allocation2 + $0x228] sm:$0xff] %vm287_vm0, %v3510_v0 }
  0xab   : > { %358 = vst.msk [vmem:[#allocation2 + $0x230] sm:$0xff] %vm287_vm0, %v3510_v0  ;;  %359 = vst.msk [vmem:[#allocation2 + $0x238] sm:$0xff] %vm287_vm0, %v3510_v0 }
  0xac   : > { %360 = vst.msk [vmem:[#allocation2 + $0x240] sm:$0xff] %vm287_vm0, %v3510_v0  ;;  %361 = vst.msk [vmem:[#allocation2 + $0x248] sm:$0xff] %vm287_vm0, %v3510_v0  ;;  %3018 = vmatmul.mubr.msk.bf16.gmra.mrb[16].mxu0 %vm1000_vm1, %v3248_v20  ;;  %3082 = vmatmul.mubr.msk.bf16.gmra.mrb[16].mxu1 %vm1000_vm1, %v3249_v21 }
  0xad   : > { %362 = vst.msk [vmem:[#allocation2 + $0x250] sm:$0xff] %vm287_vm0, %v3510_v0  ;;  %363 = vst.msk [vmem:[#allocation2 + $0x258] sm:$0xff] %vm287_vm0, %v3510_v0  ;;  %3021 = vmatprep.mubr.msk.bf16.mxu0 %vm1000_vm1, %v3250_v22  ;;  %3085 = vmatprep.mubr.msk.bf16.mxu1 %vm1000_vm1, %v3251_v23 }
  0xae   : > { %364 = vst.msk [vmem:[#allocation2 + $0x260] sm:$0xff] %vm287_vm0, %v3510_v0  ;;  %365 = vst.msk [vmem:[#allocation2 + $0x268] sm:$0xff] %vm287_vm0, %v3510_v0 }
  0xaf   : > { %366 = vst.msk [vmem:[#allocation2 + $0x270] sm:$0xff] %vm287_vm0, %v3510_v0  ;;  %367 = vst.msk [vmem:[#allocation2 + $0x278] sm:$0xff] %vm287_vm0, %v3510_v0  ;;  %v480_v5 = vld [vmem:[#allocation2 + $0x200] sm:$0xff]  ;;  %v481_v15 = vld [vmem:[#allocation2 + $0x208] sm:$0xff] }
  0xb0   : > { %368 = vst.msk [vmem:[#allocation2 + $0x280] sm:$0xff] %vm287_vm0, %v3510_v0  ;;  %369 = vst.msk [vmem:[#allocation2 + $0x288] sm:$0xff] %vm287_vm0, %v3510_v0  ;;  %v482_v3 = vld [vmem:[#allocation2 + $0x210] sm:$0xff]  ;;  %v483_v9 = vld [vmem:[#allocation2 + $0x218] sm:$0xff] }
  0xb1   : > { %370 = vst.msk [vmem:[#allocation2 + $0x290] sm:$0xff] %vm287_vm0, %v3510_v0  ;;  %371 = vst.msk [vmem:[#allocation2 + $0x298] sm:$0xff] %vm287_vm0, %v3510_v0 }
  0xb2   : > { %372 = vst.msk [vmem:[#allocation2 + $0x2a0] sm:$0xff] %vm287_vm0, %v3510_v0  ;;  %373 = vst.msk [vmem:[#allocation2 + $0x2a8] sm:$0xff] %vm287_vm0, %v3510_v0 }
  0xb3   : > { %374 = vst.msk [vmem:[#allocation2 + $0x2b0] sm:$0xff] %vm287_vm0, %v3510_v0  ;;  %375 = vst.msk [vmem:[#allocation2 + $0x2b8] sm:$0xff] %vm287_vm0, %v3510_v0 }
  0xb4   : > { %376 = vst.msk [vmem:[#allocation2 + $0x2c0] sm:$0xff] %vm287_vm0, %v3510_v0  ;;  %377 = vst.msk [vmem:[#allocation2 + $0x2c8] sm:$0xff] %vm287_vm0, %v3510_v0  ;;  %3022 = vmatmul.mubr.msk.bf16.gmra.mrb[20].mxu0 %vm1000_vm1, %v3252_v24  ;;  %3086 = vmatmul.mubr.msk.bf16.gmra.mrb[20].mxu1 %vm1000_vm1, %v3253_v25 }
  0xb5   : > { %378 = vst.msk [vmem:[#allocation2 + $0x2d0] sm:$0xff] %vm287_vm0, %v3510_v0  ;;  %379 = vst.msk [vmem:[#allocation2 + $0x2d8] sm:$0xff] %vm287_vm0, %v3510_v0  ;;  %3025 = vmatprep.mubr.msk.bf16.mxu0 %vm1000_vm1, %v3254_v26  ;;  %3089 = vmatprep.mubr.msk.bf16.mxu1 %vm1000_vm1, %v3255_v27  ;;  %v422_v26 = vld [vmem:[#allocation2 + $0x30] sm:$0xff] }
  0xb6   : > { %380 = vst.msk [vmem:[#allocation2 + $0x2e0] sm:$0xff] %vm287_vm0, %v3510_v0  ;;  %381 = vst.msk [vmem:[#allocation2 + $0x2e8] sm:$0xff] %vm287_vm0, %v3510_v0  ;;  %v486_v27 = vld [vmem:[#allocation2 + $0x230] sm:$0xff] }
  0xb7   : > { %382 = vst.msk [vmem:[#allocation2 + $0x2f0] sm:$0xff] %vm287_vm0, %v3510_v0  ;;  %383 = vst.msk [vmem:[#allocation2 + $0x2f8] sm:$0xff] %vm287_vm0, %v3510_v0 }
  0xb8   : > { %384 = vst.msk [vmem:[#allocation2 + $0x300] sm:$0xff] %vm287_vm0, %v3510_v0  ;;  %385 = vst.msk [vmem:[#allocation2 + $0x308] sm:$0xff] %vm287_vm0, %v3510_v0 }
  0xb9   : > { %386 = vst.msk [vmem:[#allocation2 + $0x310] sm:$0xff] %vm287_vm0, %v3510_v0  ;;  %387 = vst.msk [vmem:[#allocation2 + $0x318] sm:$0xff] %vm287_vm0, %v3510_v0 }
  0xba   : > { %388 = vst.msk [vmem:[#allocation2 + $0x320] sm:$0xff] %vm287_vm0, %v3510_v0  ;;  %389 = vst.msk [vmem:[#allocation2 + $0x328] sm:$0xff] %vm287_vm0, %v3510_v0 }
  0xbb   : > { %390 = vst.msk [vmem:[#allocation2 + $0x330] sm:$0xff] %vm287_vm0, %v3510_v0  ;;  %391 = vst.msk [vmem:[#allocation2 + $0x338] sm:$0xff] %vm287_vm0, %v3510_v0 }
  0xbc   : > { %392 = vst.msk [vmem:[#allocation2 + $0x340] sm:$0xff] %vm287_vm0, %v3510_v0  ;;  %393 = vst.msk [vmem:[#allocation2 + $0x348] sm:$0xff] %vm287_vm0, %v3510_v0  ;;  %3026 = vmatmul.mubr.msk.bf16.gmra.mrb[24].mxu0 %vm1000_vm1, %v3256_v28  ;;  %3090 = vmatmul.mubr.msk.bf16.gmra.mrb[24].mxu1 %vm1000_vm1, %v3257_v29  ;;  %v420_v28 = vld [vmem:[#allocation2 + $0x20] sm:$0xff] }
  0xbd   : > { %394 = vst.msk [vmem:[#allocation2 + $0x350] sm:$0xff] %vm287_vm0, %v3510_v0  ;;  %395 = vst.msk [vmem:[#allocation2 + $0x358] sm:$0xff] %vm287_vm0, %v3510_v0  ;;  %3029 = vmatprep.mubr.msk.bf16.mxu0 %vm1000_vm1, %v3258_v30  ;;  %3093 = vmatprep.mubr.msk.bf16.mxu1 %vm1000_vm1, %v3259_v31  ;;  %v484_v29 = vld [vmem:[#allocation2 + $0x220] sm:$0xff]  ;;  %v4165_v30 = vld [vmem:[#allocation8] ss:$0 sm:$0xff] }
  0xbe   : > { %396 = vst.msk [vmem:[#allocation2 + $0x360] sm:$0xff] %vm287_vm0, %v3510_v0  ;;  %397 = vst.msk [vmem:[#allocation2 + $0x368] sm:$0xff] %vm287_vm0, %v3510_v0 }
  0xbf   : > { %398 = vst.msk [vmem:[#allocation2 + $0x370] sm:$0xff] %vm287_vm0, %v3510_v0  ;;  %399 = vst.msk [vmem:[#allocation2 + $0x378] sm:$0xff] %vm287_vm0, %v3510_v0 }
  0xc0   : > { %400 = vst.msk [vmem:[#allocation2 + $0x380] sm:$0xff] %vm287_vm0, %v3510_v0  ;;  %401 = vst.msk [vmem:[#allocation2 + $0x388] sm:$0xff] %vm287_vm0, %v3510_v0 }
  0xc1   : > { %402 = vst.msk [vmem:[#allocation2 + $0x390] sm:$0xff] %vm287_vm0, %v3510_v0  ;;  %403 = vst.msk [vmem:[#allocation2 + $0x398] sm:$0xff] %vm287_vm0, %v3510_v0 }
  0xc2   : > { %404 = vst.msk [vmem:[#allocation2 + $0x3a0] sm:$0xff] %vm287_vm0, %v3510_v0  ;;  %405 = vst.msk [vmem:[#allocation2 + $0x3a8] sm:$0xff] %vm287_vm0, %v3510_v0 }
  0xc3   : > { %406 = vst.msk [vmem:[#allocation2 + $0x3b0] sm:$0xff] %vm287_vm0, %v3510_v0  ;;  %407 = vst.msk [vmem:[#allocation2 + $0x3b8] sm:$0xff] %vm287_vm0, %v3510_v0 }
  0xc4   : > { %408 = vst.msk [vmem:[#allocation2 + $0x3c0] sm:$0xff] %vm287_vm0, %v3510_v0  ;;  %409 = vst.msk [vmem:[#allocation2 + $0x3c8] sm:$0xff] %vm287_vm0, %v3510_v0  ;;  %3030 = vmatmul.mubr.msk.bf16.gmra.mrb[28].mxu0 %vm1000_vm1, %v3260_v32  ;;  %3094 = vmatmul.mubr.msk.bf16.gmra.mrb[28].mxu1 %vm1000_vm1, %v3261_v33  ;;  %v423_v33 = vld [vmem:[#allocation2 + $0x38] sm:$0xff] }
  0xc5   : > { %410 = vst.msk [vmem:[#allocation2 + $0x3d0] sm:$0xff] %vm287_vm0, %v3510_v0  ;;  %411 = vst.msk [vmem:[#allocation2 + $0x3d8] sm:$0xff] %vm287_vm0, %v3510_v0  ;;  %3033 = vmatprep.mubr.msk.bf16.mxu0 %vm1000_vm1, %v3262_v34  ;;  %3097 = vmatprep.mubr.msk.bf16.mxu1 %vm1000_vm1, %v3263_v35  ;;  %v487_v34 = vld [vmem:[#allocation2 + $0x238] sm:$0xff] }
  0xc6   : > { %412 = vst.msk [vmem:[#allocation2 + $0x3e0] sm:$0xff] %vm287_vm0, %v3510_v0  ;;  %413 = vst.msk [vmem:[#allocation2 + $0x3e8] sm:$0xff] %vm287_vm0, %v3510_v0 }
  0xc7   : > { %414 = vst.msk [vmem:[#allocation2 + $0x3f0] sm:$0xff] %vm287_vm0, %v3510_v0  ;;  %415 = vst.msk [vmem:[#allocation2 + $0x3f8] sm:$0xff] %vm287_vm0, %v3510_v0  ;;  %v3292_v0 = vld [vmem:[%s3759_s29 + $0xf8] sm:$0xff]  }
  0xcc   : > { %3034 = vmatmul.mubr.msk.bf16.gmra.mrb[32].mxu0 %vm1000_vm1, %v3264_v36  ;;  %3098 = vmatmul.mubr.msk.bf16.gmra.mrb[32].mxu1 %vm1000_vm1, %v3265_v37 }
  0xcd   : > { %3037 = vmatprep.mubr.msk.bf16.mxu0 %vm1000_vm1, %v3266_v38  ;;  %3101 = vmatprep.mubr.msk.bf16.mxu1 %vm1000_vm1, %v3267_v39  ;;  %v421_v39 = vld [vmem:[#allocation2 + $0x28] sm:$0xff] }
  0xd4   : > { %3038 = vmatmul.mubr.msk.bf16.gmra.mrb[36].mxu0 %vm1000_vm1, %v3268_v40  ;;  %3102 = vmatmul.mubr.msk.bf16.gmra.mrb[36].mxu1 %vm1000_vm1, %v3269_v41  ;;  %v485_v40 = vld [vmem:[#allocation2 + $0x228] sm:$0xff] }
  0xd5   : > { %3041 = vmatprep.mubr.msk.bf16.mxu0 %vm1000_vm1, %v3270_v42  ;;  %3105 = vmatprep.mubr.msk.bf16.mxu1 %vm1000_vm1, %v3271_v43  ;;  %v4167_v42 = vld [vmem:[#allocation9] ss:$0 sm:$0xff] }
  0xdc   : > { %3042 = vmatmul.mubr.msk.bf16.gmra.mrb[40].mxu0 %vm1000_vm1, %v3272_v44  ;;  %3106 = vmatmul.mubr.msk.bf16.gmra.mrb[40].mxu1 %vm1000_vm1, %v3273_v45 }
  0xdd   : > { %3045 = vmatprep.mubr.msk.bf16.mxu0 %vm1000_vm1, %v3274_v46  ;;  %3109 = vmatprep.mubr.msk.bf16.mxu1 %vm1000_vm1, %v3275_v47 }
  0xe4   : > { %3046 = vmatmul.mubr.msk.bf16.gmra.mrb[44].mxu0 %vm1000_vm1, %v3276_v48  ;;  %3110 = vmatmul.mubr.msk.bf16.gmra.mrb[44].mxu1 %vm1000_vm1, %v3277_v49 }
  0xe5   : > { %3049 = vmatprep.mubr.msk.bf16.mxu0 %vm1000_vm1, %v3278_v50  ;;  %3113 = vmatprep.mubr.msk.bf16.mxu1 %vm1000_vm1, %v3279_v51 }
  0xec   : > { %3050 = vmatmul.mubr.msk.bf16.gmra.mrb[48].mxu0 %vm1000_vm1, %v3280_v52  ;;  %3114 = vmatmul.mubr.msk.bf16.gmra.mrb[48].mxu1 %vm1000_vm1, %v3281_v53 }
  0xed   : > { %3053 = vmatprep.mubr.msk.bf16.mxu0 %vm1000_vm1, %v3282_v54  ;;  %3117 = vmatprep.mubr.msk.bf16.mxu1 %vm1000_vm1, %v3283_v55 }
  0xf4   : > { %3054 = vmatmul.mubr.msk.bf16.gmra.mrb[52].mxu0 %vm1000_vm1, %v3284_v56  ;;  %3118 = vmatmul.mubr.msk.bf16.gmra.mrb[52].mxu1 %vm1000_vm1, %v3285_v57 }
  0xf5   : > { %3057 = vmatprep.mubr.msk.bf16.mxu0 %vm1000_vm1, %v3286_v58  ;;  %3121 = vmatprep.mubr.msk.bf16.mxu1 %vm1000_vm1, %v3287_v59 }
  0xfc   : > { %3058 = vmatmul.mubr.msk.bf16.gmra.mrb[56].mxu0 %vm1000_vm1, %v3288_v60  ;;  %3122 = vmatmul.mubr.msk.bf16.gmra.mrb[56].mxu1 %vm1000_vm1, %v3289_v61 }
  0xfd   : > { %3061 = vmatprep.mubr.msk.bf16.mxu0 %vm1000_vm1, %v3290_v62  ;;  %3125 = vmatprep.mubr.msk.bf16.mxu1 %vm1000_vm1, %v3291_v63 }
 0x104   : > { %3062 = vmatmul.mubr.msk.bf16.gmra.mrb[60].mxu0 %vm1000_vm1, %v3292_v0  ;;  %3126 = vmatmul.mubr.msk.bf16.gmra.mrb[60].mxu1 %vm1000_vm1, %v3293_v1 }
 0x15f   : > { %v3003_v6 = vpop.f32.mrb[0].mxu0  ;;  %v3067_v7 = vpop.f32.mrb[0].mxu1 }
 0x160   : > { %v1740_v10 = vadd.f32 %v3003_v6, %v418_v2  ;;  %v1804_v11 = vadd.f32 %v3067_v7, %v482_v3  ;;  %v1227_v12 = vpop.f32.mrb[1].mxu0  ;;  %v1483_v13 = vpop.f32.mrb[1].mxu1 }
 0x161   : > { %v1738_v16 = vadd.f32 %v1227_v12, %v416_v4  ;;  %v1802_v17 = vadd.f32 %v1483_v13, %v480_v5  ;;  %v3004_v18 = vpop.f32.mrb[2].mxu0  ;;  %v3068_v19 = vpop.f32.mrb[2].mxu1 }
 0x162   : > { %1869 = vst.msk [vmem:[#allocation2 + $0x10] sm:$0xff] %vm287_vm0, %v1740_v10  ;;  %1933 = vst.msk [vmem:[#allocation2 + $0x210] sm:$0xff] %vm287_vm0, %v1804_v11  ;;  %v1741_v20 = vadd.f32 %v3004_v18, %v419_v8  ;;  %v1805_v21 = vadd.f32 %v3068_v19, %v483_v9  ;;  %v1230_v22 = vpop.f32.mrb[3].mxu0  ;;  %v1486_v23 = vpop.f32.mrb[3].mxu1  ;;  %v426_v8 = vld [vmem:[#allocation2 + $0x50] sm:$0xff] }
 0x163   : > { %1867 = vst.msk [vmem:[#allocation2] sm:$0xff] %vm287_vm0, %v1738_v16  ;;  %1931 = vst.msk [vmem:[#allocation2 + $0x200] sm:$0xff] %vm287_vm0, %v1802_v17  ;;  %v1739_v24 = vadd.f32 %v1230_v22, %v417_v14  ;;  %v1803_v25 = vadd.f32 %v1486_v23, %v481_v15  ;;  %v490_v9 = vld [vmem:[#allocation2 + $0x250] sm:$0xff]  ;;  %v424_v14 = vld [vmem:[#allocation2 + $0x40] sm:$0xff] }
 0x164   : > { %1870 = vst.msk [vmem:[#allocation2 + $0x18] sm:$0xff] %vm287_vm0, %v1741_v20  ;;  %1934 = vst.msk [vmem:[#allocation2 + $0x218] sm:$0xff] %vm287_vm0, %v1805_v21  ;;  %v488_v15 = vld [vmem:[#allocation2 + $0x240] sm:$0xff]  ;;  %v427_v22 = vld [vmem:[#allocation2 + $0x58] sm:$0xff] }
 0x165   : > { %1868 = vst.msk [vmem:[#allocation2 + $0x8] sm:$0xff] %vm287_vm0, %v1739_v24  ;;  %1932 = vst.msk [vmem:[#allocation2 + $0x208] sm:$0xff] %vm287_vm0, %v1803_v25  ;;  %v491_v23 = vld [vmem:[#allocation2 + $0x258] sm:$0xff] }
 0x167   : > { %v3007_v31 = vpop.f32.mrb[4].mxu0  ;;  %v3071_v32 = vpop.f32.mrb[4].mxu1 }
 0x168   : > { %v1744_v35 = vadd.f32 %v3007_v31, %v422_v26  ;;  %v1808_v36 = vadd.f32 %v3071_v32, %v486_v27  ;;  %v1243_v37 = vpop.f32.mrb[5].mxu0  ;;  %v1499_v38 = vpop.f32.mrb[5].mxu1  ;;  %v425_v31 = vld [vmem:[#allocation2 + $0x48] sm:$0xff] }
 0x169   : > { %v2000_v41 = vld [vmem:[#allocation2 + $0x10] sm:$0xff]  ;;  %v1742_v44 = vadd.f32 %v1243_v37, %v420_v28  ;;  %v1806_v45 = vadd.f32 %v1499_v38, %v484_v29  ;;  %v3008_v46 = vpop.f32.mrb[6].mxu0  ;;  %v3072_v47 = vpop.f32.mrb[6].mxu1  ;;  %v489_v32 = vld [vmem:[#allocation2 + $0x248] sm:$0xff] }
 0x16a   : > { %v2064_v43 = vld [vmem:[#allocation2 + $0x210] sm:$0xff]  ;;  %v2135_v48 = vmul.f32 %v4165_v30, %v2000_v41  ;;  %v1998_v50 = vld [vmem:[#allocation2] sm:$0xff]  ;;  %1873 = vst.msk [vmem:[#allocation2 + $0x30] sm:$0xff] %vm287_vm0, %v1744_v35  ;;  %1937 = vst.msk [vmem:[#allocation2 + $0x230] sm:$0xff] %vm287_vm0, %v1808_v36  ;;  %v1745_v52 = vadd.f32 %v3008_v46, %v423_v33  ;;  %v1809_v53 = vadd.f32 %v3072_v47, %v487_v34  ;;  %v1246_v54 = vpop.f32.mrb[7].mxu0  ;;  %v1502_v55 = vpop.f32.mrb[7].mxu1 }
 0x16b   : > { %v2199_v49 = vmul.f32 %v4165_v30, %v2064_v43  ;;  %v2062_v51 = vld [vmem:[#allocation2 + $0x200] sm:$0xff]  ;;  %v2133_v56 = vmul.f32 %v4165_v30, %v1998_v50  ;;  %v2001_v58 = vld [vmem:[#allocation2 + $0x18] sm:$0xff]  ;;  %1871 = vst.msk [vmem:[#allocation2 + $0x20] sm:$0xff] %vm287_vm0, %v1742_v44  ;;  %1935 = vst.msk [vmem:[#allocation2 + $0x220] sm:$0xff] %vm287_vm0, %v1806_v45  ;;  %v1743_v60 = vadd.f32 %v1246_v54, %v421_v39 }
 0x16c   : > { %v2197_v57 = vmul.f32 %v4165_v30, %v2062_v51  ;;  %v2065_v59 = vld [vmem:[#allocation2 + $0x218] sm:$0xff]  ;;  %v1807_v61 = vadd.f32 %v1502_v55, %v485_v40  ;;  %v2270_v62 = vadd.f32 %v4167_v42, %v2135_v48  ;;  %v2136_v0 = vmul.f32 %v4165_v30, %v2001_v58  ;;  %v1999_v2 = vld [vmem:[#allocation2 + $0x8] sm:$0xff]  ;;  %1874 = vst.msk [vmem:[#allocation2 + $0x38] sm:$0xff] %vm287_vm0, %v1745_v52 }
 0x16d   : > { %v2334_v63 = vadd.f32 %v4167_v42, %v2199_v49  ;;  %v2200_v1 = vmul.f32 %v4165_v30, %v2065_v59  ;;  %v2063_v3 = vld [vmem:[#allocation2 + $0x208] sm:$0xff]  ;;  %1938 = vst.msk [vmem:[#allocation2 + $0x238] sm:$0xff] %vm287_vm0, %v1809_v53  ;;  %v2268_v4 = vadd.f32 %v4167_v42, %v2133_v56  ;;  %v2134_v6 = vmul.f32 %v4165_v30, %v1999_v2  ;;  %v430_v2 = vld [vmem:[#allocation2 + $0x70] sm:$0xff] }
 0x16e   : > { %v2332_v5 = vadd.f32 %v4167_v42, %v2197_v57  ;;  %v2198_v7 = vmul.f32 %v4165_v30, %v2063_v3  ;;  %1872 = vst.msk [vmem:[#allocation2 + $0x28] sm:$0xff] %vm287_vm0, %v1743_v60  ;;  %1936 = vst.msk [vmem:[#allocation2 + $0x228] sm:$0xff] %vm287_vm0, %v1807_v61  ;;  %v2398_v10 = vmax.f32 %v2270_v62, 0.0  ;;  %v2271_v12 = vadd.f32 %v4167_v42, %v2136_v0  ;;  %v494_v3 = vld [vmem:[#allocation2 + $0x270] sm:$0xff] }
 0x16f   : > { %v2462_v11 = vmax.f32 %v2334_v63, 0.0  ;;  %v2335_v13 = vadd.f32 %v4167_v42, %v2200_v1  ;;  %v2396_v16 = vmax.f32 %v2268_v4, 0.0  ;;  %v2269_v18 = vadd.f32 %v4167_v42, %v2134_v6  ;;  %v3011_v20 = vpop.f32.mrb[8].mxu0  ;;  %v3075_v21 = vpop.f32.mrb[8].mxu1 }
 0x170   : > { %v2460_v17 = vmax.f32 %v2332_v5, 0.0  ;;  %v2333_v19 = vadd.f32 %v4167_v42, %v2198_v7  ;;  %2526 = vst.msk [vmem:[%s4196_s25 + $0x10] sm:$0xff] %vm287_vm0, %v2398_v10  ;;  %v2399_v24 = vmax.f32 %v2271_v12, 0.0  ;;  %v1748_v26 = vadd.f32 %v3011_v20, %v426_v8  ;;  %v1259_v28 = vpop.f32.mrb[9].mxu0  ;;  %v1515_v29 = vpop.f32.mrb[9].mxu1  ;;  %v428_v8 = vld [vmem:[#allocation2 + $0x60] sm:$0xff] }
 0x171   : > { %2590 = vst.msk [vmem:[%s4196_s25 + $0x210] sm:$0xff] %vm287_vm0, %v2462_v11  ;;  %v2463_v25 = vmax.f32 %v2335_v13, 0.0  ;;  %v1812_v27 = vadd.f32 %v3075_v21, %v490_v9  ;;  %2524 = vst.msk [vmem:[%s4196_s25] sm:$0xff] %vm287_vm0, %v2396_v16  ;;  %v2397_v33 = vmax.f32 %v2269_v18, 0.0  ;;  %v2004_v35 = vld [vmem:[#allocation2 + $0x30] sm:$0xff]  ;;  %v1746_v37 = vadd.f32 %v1259_v28, %v424_v14  ;;  %v3012_v39 = vpop.f32.mrb[10].mxu0 }
 0x172   : > { %2588 = vst.msk [vmem:[%s4196_s25 + $0x200] sm:$0xff] %vm287_vm0, %v2460_v17  ;;  %v2461_v34 = vmax.f32 %v2333_v19, 0.0  ;;  %v2068_v36 = vld [vmem:[#allocation2 + $0x230] sm:$0xff]  ;;  %v1810_v38 = vadd.f32 %v1515_v29, %v488_v15  ;;  %v3076_v40 = vpop.f32.mrb[10].mxu1  ;;  %2527 = vst.msk [vmem:[%s4196_s25 + $0x18] sm:$0xff] %vm287_vm0, %v2399_v24  ;;  %v2139_v41 = vmul.f32 %v4165_v30, %v2004_v35  ;;  %v2002_v44 = vld [vmem:[#allocation2 + $0x20] sm:$0xff]  ;;  %v1749_v46 = vadd.f32 %v3012_v39, %v427_v22 }
 0x173   : > { %2591 = vst.msk [vmem:[%s4196_s25 + $0x218] sm:$0xff] %vm287_vm0, %v2463_v25  ;;  %v2203_v43 = vmul.f32 %v4165_v30, %v2068_v36  ;;  %v2066_v45 = vld [vmem:[#allocation2 + $0x220] sm:$0xff]  ;;  %1877 = vst.msk [vmem:[#allocation2 + $0x50] sm:$0xff] %vm287_vm0, %v1748_v26  ;;  %v1813_v47 = vadd.f32 %v3076_v40, %v491_v23  ;;  %v1262_v48 = vpop.f32.mrb[11].mxu0  ;;  %v1518_v49 = vpop.f32.mrb[11].mxu1  ;;  %v2137_v50 = vmul.f32 %v4165_v30, %v2002_v44  ;;  %v2005_v52 = vld [vmem:[#allocation2 + $0x38] sm:$0xff] }
 0x174   : > { %1941 = vst.msk [vmem:[#allocation2 + $0x250] sm:$0xff] %vm287_vm0, %v1812_v27  ;;  %2525 = vst.msk [vmem:[%s4196_s25 + $0x8] sm:$0xff] %vm287_vm0, %v2397_v33  ;;  %v2201_v51 = vmul.f32 %v4165_v30, %v2066_v45  ;;  %v2069_v53 = vld [vmem:[#allocation2 + $0x238] sm:$0xff]  ;;  %v1747_v54 = vadd.f32 %v1262_v48, %v425_v31  ;;  %v1811_v55 = vadd.f32 %v1518_v49, %v489_v32  ;;  %v492_v9 = vld [vmem:[#allocation2 + $0x260] sm:$0xff] }
 0x175   : > { %2589 = vst.msk [vmem:[%s4196_s25 + $0x208] sm:$0xff] %vm287_vm0, %v2461_v34  ;;  %1875 = vst.msk [vmem:[#allocation2 + $0x40] sm:$0xff] %vm287_vm0, %v1746_v37  ;;  %v2274_v56 = vadd.f32 %v4167_v42, %v2139_v41  ;;  %v2338_v57 = vadd.f32 %v4167_v42, %v2203_v43  ;;  %v2140_v58 = vmul.f32 %v4165_v30, %v2005_v52  ;;  %v2003_v60 = vld [vmem:[#allocation2 + $0x28] sm:$0xff]  ;;  %v431_v16 = vld [vmem:[#allocation2 + $0x78] sm:$0xff] }
 0x176   : > { %1939 = vst.msk [vmem:[#allocation2 + $0x240] sm:$0xff] %vm287_vm0, %v1810_v38  ;;  %v2204_v59 = vmul.f32 %v4165_v30, %v2069_v53  ;;  %v2067_v61 = vld [vmem:[#allocation2 + $0x228] sm:$0xff]  ;;  %1878 = vst.msk [vmem:[#allocation2 + $0x58] sm:$0xff] %vm287_vm0, %v1749_v46  ;;  %v2272_v62 = vadd.f32 %v4167_v42, %v2137_v50  ;;  %v2336_v63 = vadd.f32 %v4167_v42, %v2201_v51  ;;  %v495_v17 = vld [vmem:[#allocation2 + $0x278] sm:$0xff] }
 0x177   : > { %1942 = vst.msk [vmem:[#allocation2 + $0x258] sm:$0xff] %vm287_vm0, %v1813_v47  ;;  %v2138_v0 = vmul.f32 %v4165_v30, %v2003_v60  ;;  %v2202_v1 = vmul.f32 %v4165_v30, %v2067_v61  ;;  %1876 = vst.msk [vmem:[#allocation2 + $0x48] sm:$0xff] %vm287_vm0, %v1747_v54  ;;  %v2402_v4 = vmax.f32 %v2274_v56, 0.0  ;;  %v2466_v5 = vmax.f32 %v2338_v57, 0.0  ;;  %v3015_v14 = vpop.f32.mrb[12].mxu0  ;;  %v3079_v15 = vpop.f32.mrb[12].mxu1 }
 0x178   : > { %1940 = vst.msk [vmem:[#allocation2 + $0x248] sm:$0xff] %vm287_vm0, %v1811_v55  ;;  %v2275_v6 = vadd.f32 %v4167_v42, %v2140_v58  ;;  %v2339_v7 = vadd.f32 %v4167_v42, %v2204_v59  ;;  %v2400_v10 = vmax.f32 %v2272_v62, 0.0  ;;  %v2464_v11 = vmax.f32 %v2336_v63, 0.0  ;;  %v1275_v22 = vpop.f32.mrb[13].mxu0  ;;  %v1531_v23 = vpop.f32.mrb[13].mxu1  ;;  %v429_v24 = vld [vmem:[#allocation2 + $0x68] sm:$0xff] }
 0x179   : > { %v2273_v12 = vadd.f32 %v4167_v42, %v2138_v0  ;;  %v2337_v13 = vadd.f32 %v4167_v42, %v2202_v1  ;;  %2530 = vst.msk [vmem:[%s4196_s25 + $0x30] sm:$0xff] %vm287_vm0, %v2402_v4  ;;  %2594 = vst.msk [vmem:[%s4196_s25 + $0x230] sm:$0xff] %vm287_vm0, %v2466_v5  ;;  %v1752_v20 = vadd.f32 %v3015_v14, %v430_v2  ;;  %v493_v25 = vld [vmem:[#allocation2 + $0x268] sm:$0xff]  ;;  %v3016_v33 = vpop.f32.mrb[14].mxu0  ;;  %v3080_v34 = vpop.f32.mrb[14].mxu1  ;;  %v434_v60 = vld [vmem:[#allocation2 + $0x90] sm:$0xff] }
 0x17a   : > { %v2403_v18 = vmax.f32 %v2275_v6, 0.0  ;;  %v2467_v19 = vmax.f32 %v2339_v7, 0.0  ;;  %v1816_v21 = vadd.f32 %v3079_v15, %v494_v3  ;;  %2528 = vst.msk [vmem:[%s4196_s25 + $0x20] sm:$0xff] %vm287_vm0, %v2400_v10  ;;  %2592 = vst.msk [vmem:[%s4196_s25 + $0x220] sm:$0xff] %vm287_vm0, %v2464_v11  ;;  %v2008_v28 = vld [vmem:[#allocation2 + $0x50] sm:$0xff]  ;;  %v1750_v31 = vadd.f32 %v1275_v22, %v428_v8  ;;  %v1278_v41 = vpop.f32.mrb[15].mxu0 }
 0x17b   : > { %v2401_v26 = vmax.f32 %v2273_v12, 0.0  ;;  %v2465_v27 = vmax.f32 %v2337_v13, 0.0  ;;  %v2072_v29 = vld [vmem:[#allocation2 + $0x250] sm:$0xff]  ;;  %v1814_v32 = vadd.f32 %v1531_v23, %v492_v9  ;;  %v2143_v35 = vmul.f32 %v4165_v30, %v2008_v28  ;;  %1881 = vst.msk [vmem:[#allocation2 + $0x70] sm:$0xff] %vm287_vm0, %v1752_v20  ;;  %v1534_v43 = vpop.f32.mrb[15].mxu1  ;;  %v432_v2 = vld [vmem:[#allocation2 + $0x80] sm:$0xff] }
 0x17c   : > { %2531 = vst.msk [vmem:[%s4196_s25 + $0x38] sm:$0xff] %vm287_vm0, %v2403_v18  ;;  %2595 = vst.msk [vmem:[%s4196_s25 + $0x238] sm:$0xff] %vm287_vm0, %v2467_v19  ;;  %v2207_v36 = vmul.f32 %v4165_v30, %v2072_v29  ;;  %v2006_v37 = vld [vmem:[#allocation2 + $0x40] sm:$0xff]  ;;  %v1753_v39 = vadd.f32 %v3016_v33, %v431_v16  ;;  %v1817_v40 = vadd.f32 %v3080_v34, %v495_v17  ;;  %v498_v61 = vld [vmem:[#allocation2 + $0x290] sm:$0xff] }
 0x17d   : > { %v2070_v38 = vld [vmem:[#allocation2 + $0x240] sm:$0xff]  ;;  %1945 = vst.msk [vmem:[#allocation2 + $0x270] sm:$0xff] %vm287_vm0, %v1816_v21  ;;  %2529 = vst.msk [vmem:[%s4196_s25 + $0x28] sm:$0xff] %vm287_vm0, %v2401_v26  ;;  %v2141_v44 = vmul.f32 %v4165_v30, %v2006_v37  ;;  %v2009_v46 = vld [vmem:[#allocation2 + $0x58] sm:$0xff]  ;;  %v1751_v48 = vadd.f32 %v1278_v41, %v429_v24  ;;  %v1815_v49 = vadd.f32 %v1534_v43, %v493_v25 }
 0x17e   : > { %2593 = vst.msk [vmem:[%s4196_s25 + $0x228] sm:$0xff] %vm287_vm0, %v2465_v27  ;;  %v2205_v45 = vmul.f32 %v4165_v30, %v2070_v38  ;;  %v2073_v47 = vld [vmem:[#allocation2 + $0x258] sm:$0xff]  ;;  %1879 = vst.msk [vmem:[#allocation2 + $0x60] sm:$0xff] %vm287_vm0, %v1750_v31  ;;  %v2278_v50 = vadd.f32 %v4167_v42, %v2143_v35  ;;  %v2342_v51 = vadd.f32 %v4167_v42, %v2207_v36  ;;  %v2007_v54 = vld [vmem:[#allocation2 + $0x48] sm:$0xff] }
 0x17f   : > { %1943 = vst.msk [vmem:[#allocation2 + $0x260] sm:$0xff] %vm287_vm0, %v1814_v32  ;;  %v2144_v52 = vmul.f32 %v4165_v30, %v2009_v46  ;;  %v2208_v53 = vmul.f32 %v4165_v30, %v2073_v47  ;;  %v2071_v55 = vld [vmem:[#allocation2 + $0x248] sm:$0xff]  ;;  %1882 = vst.msk [vmem:[#allocation2 + $0x78] sm:$0xff] %vm287_vm0, %v1753_v39  ;;  %v2276_v56 = vadd.f32 %v4167_v42, %v2141_v44  ;;  %v496_v3 = vld [vmem:[#allocation2 + $0x280] sm:$0xff]  ;;  %v3019_v8 = vpop.f32.mrb[16].mxu0  ;;  %v3083_v9 = vpop.f32.mrb[16].mxu1 }
 0x180   : > { %1946 = vst.msk [vmem:[#allocation2 + $0x278] sm:$0xff] %vm287_vm0, %v1817_v40  ;;  %v2340_v57 = vadd.f32 %v4167_v42, %v2205_v45  ;;  %v2142_v58 = vmul.f32 %v4165_v30, %v2007_v54  ;;  %v2206_v59 = vmul.f32 %v4165_v30, %v2071_v55  ;;  %1880 = vst.msk [vmem:[#allocation2 + $0x68] sm:$0xff] %vm287_vm0, %v1751_v48  ;;  %v2406_v62 = vmax.f32 %v2278_v50, 0.0  ;;  %v435_v10 = vld [vmem:[#allocation2 + $0x98] sm:$0xff]  ;;  %v1291_v16 = vpop.f32.mrb[17].mxu0  ;;  %v1547_v17 = vpop.f32.mrb[17].mxu1 }
 0x181   : > { %1944 = vst.msk [vmem:[#allocation2 + $0x268] sm:$0xff] %vm287_vm0, %v1815_v49  ;;  %v2470_v63 = vmax.f32 %v2342_v51, 0.0  ;;  %v2279_v0 = vadd.f32 %v4167_v42, %v2144_v52  ;;  %v2343_v1 = vadd.f32 %v4167_v42, %v2208_v53  ;;  %v2404_v4 = vmax.f32 %v2276_v56, 0.0  ;;  %v499_v11 = vld [vmem:[#allocation2 + $0x298] sm:$0xff]  ;;  %v433_v18 = vld [vmem:[#allocation2 + $0x88] sm:$0xff]  ;;  %v3020_v26 = vpop.f32.mrb[18].mxu0 }
 0x182   : > { %v2468_v5 = vmax.f32 %v2340_v57, 0.0  ;;  %v2277_v6 = vadd.f32 %v4167_v42, %v2142_v58  ;;  %v2341_v7 = vadd.f32 %v4167_v42, %v2206_v59  ;;  %2534 = vst.msk [vmem:[%s4196_s25 + $0x50] sm:$0xff] %vm287_vm0, %v2406_v62  ;;  %v1756_v14 = vadd.f32 %v3019_v8, %v434_v60  ;;  %v497_v19 = vld [vmem:[#allocation2 + $0x288] sm:$0xff]  ;;  %v2012_v22 = vld [vmem:[#allocation2 + $0x70] sm:$0xff]  ;;  %v3084_v27 = vpop.f32.mrb[18].mxu1  ;;  %v1294_v35 = vpop.f32.mrb[19].mxu0 }
 0x183   : > { %2598 = vst.msk [vmem:[%s4196_s25 + $0x250] sm:$0xff] %vm287_vm0, %v2470_v63  ;;  %v2407_v12 = vmax.f32 %v2279_v0, 0.0  ;;  %v2471_v13 = vmax.f32 %v2343_v1, 0.0  ;;  %v1820_v15 = vadd.f32 %v3083_v9, %v498_v61  ;;  %2532 = vst.msk [vmem:[%s4196_s25 + $0x40] sm:$0xff] %vm287_vm0, %v2404_v4  ;;  %v1754_v24 = vadd.f32 %v1291_v16, %v432_v2  ;;  %v1550_v36 = vpop.f32.mrb[19].mxu1  ;;  %v438_v54 = vld [vmem:[#allocation2 + $0xb0] sm:$0xff] }
 0x184   : > { %2596 = vst.msk [vmem:[%s4196_s25 + $0x240] sm:$0xff] %vm287_vm0, %v2468_v5  ;;  %v2405_v20 = vmax.f32 %v2277_v6, 0.0  ;;  %v2469_v21 = vmax.f32 %v2341_v7, 0.0  ;;  %v2076_v23 = vld [vmem:[#allocation2 + $0x270] sm:$0xff]  ;;  %v1818_v25 = vadd.f32 %v1547_v17, %v496_v3  ;;  %v2147_v28 = vmul.f32 %v4165_v30, %v2012_v22  ;;  %1885 = vst.msk [vmem:[#allocation2 + $0x90] sm:$0xff] %vm287_vm0, %v1756_v14  ;;  %v436_v60 = vld [vmem:[#allocation2 + $0xa0] sm:$0xff] }
 0x185   : > { %2535 = vst.msk [vmem:[%s4196_s25 + $0x58] sm:$0xff] %vm287_vm0, %v2407_v12  ;;  %2599 = vst.msk [vmem:[%s4196_s25 + $0x258] sm:$0xff] %vm287_vm0, %v2471_v13  ;;  %v2211_v29 = vmul.f32 %v4165_v30, %v2076_v23  ;;  %v2010_v31 = vld [vmem:[#allocation2 + $0x60] sm:$0xff]  ;;  %v1757_v33 = vadd.f32 %v3020_v26, %v435_v10  ;;  %v1821_v34 = vadd.f32 %v3084_v27, %v499_v11  ;;  %v502_v55 = vld [vmem:[#allocation2 + $0x2b0] sm:$0xff] }
 0x186   : > { %v2074_v32 = vld [vmem:[#allocation2 + $0x260] sm:$0xff]  ;;  %1949 = vst.msk [vmem:[#allocation2 + $0x290] sm:$0xff] %vm287_vm0, %v1820_v15  ;;  %2533 = vst.msk [vmem:[%s4196_s25 + $0x48] sm:$0xff] %vm287_vm0, %v2405_v20  ;;  %v2145_v37 = vmul.f32 %v4165_v30, %v2010_v31  ;;  %v2013_v39 = vld [vmem:[#allocation2 + $0x78] sm:$0xff]  ;;  %v1755_v41 = vadd.f32 %v1294_v35, %v433_v18  ;;  %v1819_v43 = vadd.f32 %v1550_v36, %v497_v19 }
 0x187   : > { %2597 = vst.msk [vmem:[%s4196_s25 + $0x248] sm:$0xff] %vm287_vm0, %v2469_v21  ;;  %v2209_v38 = vmul.f32 %v4165_v30, %v2074_v32  ;;  %v2077_v40 = vld [vmem:[#allocation2 + $0x278] sm:$0xff]  ;;  %1883 = vst.msk [vmem:[#allocation2 + $0x80] sm:$0xff] %vm287_vm0, %v1754_v24  ;;  %v2282_v44 = vadd.f32 %v4167_v42, %v2147_v28  ;;  %v2346_v45 = vadd.f32 %v4167_v42, %v2211_v29  ;;  %v2011_v48 = vld [vmem:[#allocation2 + $0x68] sm:$0xff]  ;;  %v3023_v2 = vpop.f32.mrb[20].mxu0  ;;  %v3087_v3 = vpop.f32.mrb[20].mxu1 }
 0x188   : > { %1947 = vst.msk [vmem:[#allocation2 + $0x280] sm:$0xff] %vm287_vm0, %v1818_v25  ;;  %v2148_v46 = vmul.f32 %v4165_v30, %v2013_v39  ;;  %v2212_v47 = vmul.f32 %v4165_v30, %v2077_v40  ;;  %v2075_v49 = vld [vmem:[#allocation2 + $0x268] sm:$0xff]  ;;  %1886 = vst.msk [vmem:[#allocation2 + $0x98] sm:$0xff] %vm287_vm0, %v1757_v33  ;;  %v2280_v50 = vadd.f32 %v4167_v42, %v2145_v37  ;;  %v500_v61 = vld [vmem:[#allocation2 + $0x2a0] sm:$0xff]  ;;  %v1307_v10 = vpop.f32.mrb[21].mxu0  ;;  %v1563_v11 = vpop.f32.mrb[21].mxu1 }
 0x189   : > { %1950 = vst.msk [vmem:[#allocation2 + $0x298] sm:$0xff] %vm287_vm0, %v1821_v34  ;;  %v2344_v51 = vadd.f32 %v4167_v42, %v2209_v38  ;;  %v2146_v52 = vmul.f32 %v4165_v30, %v2011_v48  ;;  %v2210_v53 = vmul.f32 %v4165_v30, %v2075_v49  ;;  %1884 = vst.msk [vmem:[#allocation2 + $0x88] sm:$0xff] %vm287_vm0, %v1755_v41  ;;  %v2410_v56 = vmax.f32 %v2282_v44, 0.0  ;;  %v439_v4 = vld [vmem:[#allocation2 + $0xb8] sm:$0xff]  ;;  %v437_v12 = vld [vmem:[#allocation2 + $0xa8] sm:$0xff]  ;;  %v3024_v20 = vpop.f32.mrb[22].mxu0 }
 0x18a   : > { %1948 = vst.msk [vmem:[#allocation2 + $0x288] sm:$0xff] %vm287_vm0, %v1819_v43  ;;  %v2474_v57 = vmax.f32 %v2346_v45, 0.0  ;;  %v2283_v58 = vadd.f32 %v4167_v42, %v2148_v46  ;;  %v2347_v59 = vadd.f32 %v4167_v42, %v2212_v47  ;;  %v2408_v62 = vmax.f32 %v2280_v50, 0.0  ;;  %v503_v5 = vld [vmem:[#allocation2 + $0x2b8] sm:$0xff]  ;;  %v501_v13 = vld [vmem:[#allocation2 + $0x2a8] sm:$0xff]  ;;  %v3088_v21 = vpop.f32.mrb[22].mxu1 }
 0x18b   : > { %v2472_v63 = vmax.f32 %v2344_v51, 0.0  ;;  %v2281_v0 = vadd.f32 %v4167_v42, %v2146_v52  ;;  %v2345_v1 = vadd.f32 %v4167_v42, %v2210_v53  ;;  %2538 = vst.msk [vmem:[%s4196_s25 + $0x70] sm:$0xff] %vm287_vm0, %v2410_v56  ;;  %v1760_v8 = vadd.f32 %v3023_v2, %v438_v54  ;;  %v2016_v16 = vld [vmem:[#allocation2 + $0x90] sm:$0xff]  ;;  %v1310_v28 = vpop.f32.mrb[23].mxu0  ;;  %v1566_v29 = vpop.f32.mrb[23].mxu1  ;;  %v440_v54 = vld [vmem:[#allocation2 + $0xc0] sm:$0xff] }
 0x18c   : > { %2602 = vst.msk [vmem:[%s4196_s25 + $0x270] sm:$0xff] %vm287_vm0, %v2474_v57  ;;  %v2411_v6 = vmax.f32 %v2283_v58, 0.0  ;;  %v2475_v7 = vmax.f32 %v2347_v59, 0.0  ;;  %v1824_v9 = vadd.f32 %v3087_v3, %v502_v55  ;;  %2536 = vst.msk [vmem:[%s4196_s25 + $0x60] sm:$0xff] %vm287_vm0, %v2408_v62  ;;  %v1758_v18 = vadd.f32 %v1307_v10, %v436_v60  ;;  %v442_v48 = vld [vmem:[#allocation2 + $0xd0] sm:$0xff]  ;;  %v504_v55 = vld [vmem:[#allocation2 + $0x2c0] sm:$0xff] }
 0x18d   : > { %2600 = vst.msk [vmem:[%s4196_s25 + $0x260] sm:$0xff] %vm287_vm0, %v2472_v63  ;;  %v2409_v14 = vmax.f32 %v2281_v0, 0.0  ;;  %v2473_v15 = vmax.f32 %v2345_v1, 0.0  ;;  %v2080_v17 = vld [vmem:[#allocation2 + $0x290] sm:$0xff]  ;;  %v1822_v19 = vadd.f32 %v1563_v11, %v500_v61  ;;  %v2151_v22 = vmul.f32 %v4165_v30, %v2016_v16  ;;  %1889 = vst.msk [vmem:[#allocation2 + $0xb0] sm:$0xff] %vm287_vm0, %v1760_v8  ;;  %v443_v62 = vld [vmem:[#allocation2 + $0xd8] sm:$0xff] }
 0x18e   : > { %2539 = vst.msk [vmem:[%s4196_s25 + $0x78] sm:$0xff] %vm287_vm0, %v2411_v6  ;;  %2603 = vst.msk [vmem:[%s4196_s25 + $0x278] sm:$0xff] %vm287_vm0, %v2475_v7  ;;  %v2215_v23 = vmul.f32 %v4165_v30, %v2080_v17  ;;  %v2014_v24 = vld [vmem:[#allocation2 + $0x80] sm:$0xff]  ;;  %v1761_v26 = vadd.f32 %v3024_v20, %v439_v4  ;;  %v1825_v27 = vadd.f32 %v3088_v21, %v503_v5  ;;  %v506_v49 = vld [vmem:[#allocation2 + $0x2d0] sm:$0xff] }
 0x18f   : > { %v2078_v25 = vld [vmem:[#allocation2 + $0x280] sm:$0xff]  ;;  %1953 = vst.msk [vmem:[#allocation2 + $0x2b0] sm:$0xff] %vm287_vm0, %v1824_v9  ;;  %2537 = vst.msk [vmem:[%s4196_s25 + $0x68] sm:$0xff] %vm287_vm0, %v2409_v14  ;;  %v2149_v31 = vmul.f32 %v4165_v30, %v2014_v24  ;;  %v2017_v33 = vld [vmem:[#allocation2 + $0x98] sm:$0xff]  ;;  %v1759_v35 = vadd.f32 %v1310_v28, %v437_v12  ;;  %v1823_v36 = vadd.f32 %v1566_v29, %v501_v13  ;;  %v3027_v60 = vpop.f32.mrb[24].mxu0  ;;  %v3091_v61 = vpop.f32.mrb[24].mxu1 }
 0x190   : > { %2601 = vst.msk [vmem:[%s4196_s25 + $0x268] sm:$0xff] %vm287_vm0, %v2473_v15  ;;  %v2213_v32 = vmul.f32 %v4165_v30, %v2078_v25  ;;  %v2081_v34 = vld [vmem:[#allocation2 + $0x298] sm:$0xff]  ;;  %1887 = vst.msk [vmem:[#allocation2 + $0xa0] sm:$0xff] %vm287_vm0, %v1758_v18  ;;  %v2286_v37 = vadd.f32 %v4167_v42, %v2151_v22  ;;  %v2350_v38 = vadd.f32 %v4167_v42, %v2215_v23  ;;  %v2015_v41 = vld [vmem:[#allocation2 + $0x88] sm:$0xff]  ;;  %v1323_v4 = vpop.f32.mrb[25].mxu0  ;;  %v1579_v5 = vpop.f32.mrb[25].mxu1 }
 0x191   : > { %1951 = vst.msk [vmem:[#allocation2 + $0x2a0] sm:$0xff] %vm287_vm0, %v1822_v19  ;;  %v2152_v39 = vmul.f32 %v4165_v30, %v2017_v33  ;;  %v2216_v40 = vmul.f32 %v4165_v30, %v2081_v34  ;;  %v2079_v43 = vld [vmem:[#allocation2 + $0x288] sm:$0xff]  ;;  %1890 = vst.msk [vmem:[#allocation2 + $0xb8] sm:$0xff] %vm287_vm0, %v1761_v26  ;;  %v2284_v44 = vadd.f32 %v4167_v42, %v2149_v31  ;;  %v507_v63 = vld [vmem:[#allocation2 + $0x2d8] sm:$0xff]  ;;  %v3028_v14 = vpop.f32.mrb[26].mxu0  ;;  %v3092_v15 = vpop.f32.mrb[26].mxu1 }
 0x192   : > { %1954 = vst.msk [vmem:[#allocation2 + $0x2b8] sm:$0xff] %vm287_vm0, %v1825_v27  ;;  %v2348_v45 = vadd.f32 %v4167_v42, %v2213_v32  ;;  %v2150_v46 = vmul.f32 %v4165_v30, %v2015_v41  ;;  %v2214_v47 = vmul.f32 %v4165_v30, %v2079_v43  ;;  %1888 = vst.msk [vmem:[#allocation2 + $0xa8] sm:$0xff] %vm287_vm0, %v1759_v35  ;;  %v2414_v50 = vmax.f32 %v2286_v37, 0.0  ;;  %v441_v6 = vld [vmem:[#allocation2 + $0xc8] sm:$0xff]  ;;  %v1326_v22 = vpop.f32.mrb[27].mxu0  ;;  %v1582_v23 = vpop.f32.mrb[27].mxu1 }
 0x193   : > { %1952 = vst.msk [vmem:[#allocation2 + $0x2a8] sm:$0xff] %vm287_vm0, %v1823_v36  ;;  %v2478_v51 = vmax.f32 %v2350_v38, 0.0  ;;  %v2287_v52 = vadd.f32 %v4167_v42, %v2152_v39  ;;  %v2351_v53 = vadd.f32 %v4167_v42, %v2216_v40  ;;  %v2412_v56 = vmax.f32 %v2284_v44, 0.0  ;;  %v505_v7 = vld [vmem:[#allocation2 + $0x2c8] sm:$0xff]  ;;  %v446_v41 = vld [vmem:[#allocation2 + $0xf0] sm:$0xff] }
 0x194   : > { %v2476_v57 = vmax.f32 %v2348_v45, 0.0  ;;  %v2285_v58 = vadd.f32 %v4167_v42, %v2150_v46  ;;  %v2349_v59 = vadd.f32 %v4167_v42, %v2214_v47  ;;  %2542 = vst.msk [vmem:[%s4196_s25 + $0x90] sm:$0xff] %vm287_vm0, %v2414_v50  ;;  %v1764_v2 = vadd.f32 %v3027_v60, %v442_v48  ;;  %v2020_v10 = vld [vmem:[#allocation2 + $0xb0] sm:$0xff]  ;;  %v444_v48 = vld [vmem:[#allocation2 + $0xe0] sm:$0xff] }
 0x195   : > { %2606 = vst.msk [vmem:[%s4196_s25 + $0x290] sm:$0xff] %vm287_vm0, %v2478_v51  ;;  %v2415_v0 = vmax.f32 %v2287_v52, 0.0  ;;  %v2479_v1 = vmax.f32 %v2351_v53, 0.0  ;;  %v1828_v3 = vadd.f32 %v3091_v61, %v506_v49  ;;  %2540 = vst.msk [vmem:[%s4196_s25 + $0x80] sm:$0xff] %vm287_vm0, %v2412_v56  ;;  %v1762_v12 = vadd.f32 %v1323_v4, %v440_v54  ;;  %v510_v43 = vld [vmem:[#allocation2 + $0x2f0] sm:$0xff]  ;;  %v508_v49 = vld [vmem:[#allocation2 + $0x2e0] sm:$0xff] }
 0x196   : > { %2604 = vst.msk [vmem:[%s4196_s25 + $0x280] sm:$0xff] %vm287_vm0, %v2476_v57  ;;  %v2413_v8 = vmax.f32 %v2285_v58, 0.0  ;;  %v2477_v9 = vmax.f32 %v2349_v59, 0.0  ;;  %v2084_v11 = vld [vmem:[#allocation2 + $0x2b0] sm:$0xff]  ;;  %v1826_v13 = vadd.f32 %v1579_v5, %v504_v55  ;;  %v2155_v16 = vmul.f32 %v4165_v30, %v2020_v10  ;;  %1893 = vst.msk [vmem:[#allocation2 + $0xd0] sm:$0xff] %vm287_vm0, %v1764_v2  ;;  %v447_v56 = vld [vmem:[#allocation2 + $0xf8] sm:$0xff] }
 0x197   : > { %2543 = vst.msk [vmem:[%s4196_s25 + $0x98] sm:$0xff] %vm287_vm0, %v2415_v0  ;;  %2607 = vst.msk [vmem:[%s4196_s25 + $0x298] sm:$0xff] %vm287_vm0, %v2479_v1  ;;  %v2219_v17 = vmul.f32 %v4165_v30, %v2084_v11  ;;  %v2018_v18 = vld [vmem:[#allocation2 + $0xa0] sm:$0xff]  ;;  %v1765_v20 = vadd.f32 %v3028_v14, %v443_v62  ;;  %v1829_v21 = vadd.f32 %v3092_v15, %v507_v63  ;;  %v3031_v54 = vpop.f32.mrb[28].mxu0  ;;  %v3095_v55 = vpop.f32.mrb[28].mxu1  ;;  %v511_v57 = vld [vmem:[#allocation2 + $0x2f8] sm:$0xff] }
 0x198   : > { %v2082_v19 = vld [vmem:[#allocation2 + $0x2a0] sm:$0xff]  ;;  %1957 = vst.msk [vmem:[#allocation2 + $0x2d0] sm:$0xff] %vm287_vm0, %v1828_v3  ;;  %2541 = vst.msk [vmem:[%s4196_s25 + $0x88] sm:$0xff] %vm287_vm0, %v2413_v8  ;;  %v2153_v24 = vmul.f32 %v4165_v30, %v2018_v18  ;;  %v2021_v26 = vld [vmem:[#allocation2 + $0xb8] sm:$0xff]  ;;  %v1763_v28 = vadd.f32 %v1326_v22, %v441_v6  ;;  %v1827_v29 = vadd.f32 %v1582_v23, %v505_v7  ;;  %v1339_v62 = vpop.f32.mrb[29].mxu0  ;;  %v1595_v63 = vpop.f32.mrb[29].mxu1 }
 0x199   : > { %2605 = vst.msk [vmem:[%s4196_s25 + $0x288] sm:$0xff] %vm287_vm0, %v2477_v9  ;;  %v2217_v25 = vmul.f32 %v4165_v30, %v2082_v19  ;;  %v2085_v27 = vld [vmem:[#allocation2 + $0x2b8] sm:$0xff]  ;;  %1891 = vst.msk [vmem:[#allocation2 + $0xc0] sm:$0xff] %vm287_vm0, %v1762_v12  ;;  %v2290_v31 = vadd.f32 %v4167_v42, %v2155_v16  ;;  %v2354_v32 = vadd.f32 %v4167_v42, %v2219_v17  ;;  %v2019_v35 = vld [vmem:[#allocation2 + $0xa8] sm:$0xff]  ;;  %v3032_v8 = vpop.f32.mrb[30].mxu0  ;;  %v3096_v9 = vpop.f32.mrb[30].mxu1 }
 0x19a   : > { %1955 = vst.msk [vmem:[#allocation2 + $0x2c0] sm:$0xff] %vm287_vm0, %v1826_v13  ;;  %v2156_v33 = vmul.f32 %v4165_v30, %v2021_v26  ;;  %v2220_v34 = vmul.f32 %v4165_v30, %v2085_v27  ;;  %v2083_v36 = vld [vmem:[#allocation2 + $0x2a8] sm:$0xff]  ;;  %1894 = vst.msk [vmem:[#allocation2 + $0xd8] sm:$0xff] %vm287_vm0, %v1765_v20  ;;  %v2288_v37 = vadd.f32 %v4167_v42, %v2153_v24  ;;  %v1342_v16 = vpop.f32.mrb[31].mxu0  ;;  %v1598_v17 = vpop.f32.mrb[31].mxu1 }
 0x19b   : > { %1958 = vst.msk [vmem:[#allocation2 + $0x2d8] sm:$0xff] %vm287_vm0, %v1829_v21  ;;  %v2352_v38 = vadd.f32 %v4167_v42, %v2217_v25  ;;  %v2154_v39 = vmul.f32 %v4165_v30, %v2019_v35  ;;  %v2218_v40 = vmul.f32 %v4165_v30, %v2083_v36  ;;  %1892 = vst.msk [vmem:[#allocation2 + $0xc8] sm:$0xff] %vm287_vm0, %v1763_v28  ;;  %v2418_v44 = vmax.f32 %v2290_v31, 0.0  ;;  %v445_v0 = vld [vmem:[#allocation2 + $0xe8] sm:$0xff]  ;;  %v450_v35 = vld [vmem:[#allocation2 + $0x110] sm:$0xff] }
 0x19c   : > { %1956 = vst.msk [vmem:[#allocation2 + $0x2c8] sm:$0xff] %vm287_vm0, %v1827_v29  ;;  %v2482_v45 = vmax.f32 %v2354_v32, 0.0  ;;  %v2291_v46 = vadd.f32 %v4167_v42, %v2156_v33  ;;  %v2355_v47 = vadd.f32 %v4167_v42, %v2220_v34  ;;  %v2416_v50 = vmax.f32 %v2288_v37, 0.0  ;;  %v509_v1 = vld [vmem:[#allocation2 + $0x2e8] sm:$0xff]  ;;  %v514_v36 = vld [vmem:[#allocation2 + $0x310] sm:$0xff] }
 0x19d   : > { %v2480_v51 = vmax.f32 %v2352_v38, 0.0  ;;  %v2289_v52 = vadd.f32 %v4167_v42, %v2154_v39  ;;  %v2353_v53 = vadd.f32 %v4167_v42, %v2218_v40  ;;  %2546 = vst.msk [vmem:[%s4196_s25 + $0xb0] sm:$0xff] %vm287_vm0, %v2418_v44  ;;  %v1768_v60 = vadd.f32 %v3031_v54, %v446_v41  ;;  %v2024_v4 = vld [vmem:[#allocation2 + $0xd0] sm:$0xff]  ;;  %v448_v41 = vld [vmem:[#allocation2 + $0x100] sm:$0xff] }
 0x19e   : > { %2610 = vst.msk [vmem:[%s4196_s25 + $0x2b0] sm:$0xff] %vm287_vm0, %v2482_v45  ;;  %v2419_v58 = vmax.f32 %v2291_v46, 0.0  ;;  %v2483_v59 = vmax.f32 %v2355_v47, 0.0  ;;  %v1832_v61 = vadd.f32 %v3095_v55, %v510_v43  ;;  %2544 = vst.msk [vmem:[%s4196_s25 + $0xa0] sm:$0xff] %vm287_vm0, %v2416_v50  ;;  %v1766_v6 = vadd.f32 %v1339_v62, %v444_v48  ;;  %v512_v43 = vld [vmem:[#allocation2 + $0x300] sm:$0xff]  ;;  %v515_v50 = vld [vmem:[#allocation2 + $0x318] sm:$0xff] }
 0x19f   : > { %2608 = vst.msk [vmem:[%s4196_s25 + $0x2a0] sm:$0xff] %vm287_vm0, %v2480_v51  ;;  %v2417_v2 = vmax.f32 %v2289_v52, 0.0  ;;  %v2481_v3 = vmax.f32 %v2353_v53, 0.0  ;;  %v2088_v5 = vld [vmem:[#allocation2 + $0x2d0] sm:$0xff]  ;;  %v1830_v7 = vadd.f32 %v1595_v63, %v508_v49  ;;  %v2159_v10 = vmul.f32 %v4165_v30, %v2024_v4  ;;  %1897 = vst.msk [vmem:[#allocation2 + $0xf0] sm:$0xff] %vm287_vm0, %v1768_v60  ;;  %v3035_v47 = vpop.f32.mrb[32].mxu0 }
 0x1a0   : > { %2547 = vst.msk [vmem:[%s4196_s25 + $0xb8] sm:$0xff] %vm287_vm0, %v2419_v58  ;;  %2611 = vst.msk [vmem:[%s4196_s25 + $0x2b8] sm:$0xff] %vm287_vm0, %v2483_v59  ;;  %v2223_v11 = vmul.f32 %v4165_v30, %v2088_v5  ;;  %v2022_v12 = vld [vmem:[#allocation2 + $0xc0] sm:$0xff]  ;;  %v1769_v14 = vadd.f32 %v3032_v8, %v447_v56  ;;  %v1833_v15 = vadd.f32 %v3096_v9, %v511_v57  ;;  %v3099_v48 = vpop.f32.mrb[32].mxu1  ;;  %v451_v49 = vld [vmem:[#allocation2 + $0x118] sm:$0xff]  ;;  %v1355_v55 = vpop.f32.mrb[33].mxu0 }
 0x1a1   : > { %v2086_v13 = vld [vmem:[#allocation2 + $0x2c0] sm:$0xff]  ;;  %1961 = vst.msk [vmem:[#allocation2 + $0x2f0] sm:$0xff] %vm287_vm0, %v1832_v61  ;;  %2545 = vst.msk [vmem:[%s4196_s25 + $0xa8] sm:$0xff] %vm287_vm0, %v2417_v2  ;;  %v2157_v18 = vmul.f32 %v4165_v30, %v2022_v12  ;;  %v2025_v20 = vld [vmem:[#allocation2 + $0xd8] sm:$0xff]  ;;  %v1767_v22 = vadd.f32 %v1342_v16, %v445_v0  ;;  %v1831_v23 = vadd.f32 %v1598_v17, %v509_v1  ;;  %v1611_v56 = vpop.f32.mrb[33].mxu1  ;;  %v3036_v0 = vpop.f32.mrb[34].mxu0 }
 0x1a2   : > { %2609 = vst.msk [vmem:[%s4196_s25 + $0x2a8] sm:$0xff] %vm287_vm0, %v2481_v3  ;;  %v2221_v19 = vmul.f32 %v4165_v30, %v2086_v13  ;;  %v2089_v21 = vld [vmem:[#allocation2 + $0x2d8] sm:$0xff]  ;;  %1895 = vst.msk [vmem:[#allocation2 + $0xe0] sm:$0xff] %vm287_vm0, %v1766_v6  ;;  %v2294_v24 = vadd.f32 %v4167_v42, %v2159_v10  ;;  %v2358_v25 = vadd.f32 %v4167_v42, %v2223_v11  ;;  %v2023_v28 = vld [vmem:[#allocation2 + $0xc8] sm:$0xff]  ;;  %v3100_v1 = vpop.f32.mrb[34].mxu1  ;;  %v1358_v9 = vpop.f32.mrb[35].mxu0 }
 0x1a3   : > { %1959 = vst.msk [vmem:[#allocation2 + $0x2e0] sm:$0xff] %vm287_vm0, %v1830_v7  ;;  %v2160_v26 = vmul.f32 %v4165_v30, %v2025_v20  ;;  %v2224_v27 = vmul.f32 %v4165_v30, %v2089_v21  ;;  %v2087_v29 = vld [vmem:[#allocation2 + $0x2c8] sm:$0xff]  ;;  %1898 = vst.msk [vmem:[#allocation2 + $0xf8] sm:$0xff] %vm287_vm0, %v1769_v14  ;;  %v2292_v31 = vadd.f32 %v4167_v42, %v2157_v18  ;;  %v1614_v10 = vpop.f32.mrb[35].mxu1 }
 0x1a4   : > { %1962 = vst.msk [vmem:[#allocation2 + $0x2f8] sm:$0xff] %vm287_vm0, %v1833_v15  ;;  %v2356_v32 = vadd.f32 %v4167_v42, %v2221_v19  ;;  %v2158_v33 = vmul.f32 %v4165_v30, %v2023_v28  ;;  %v2222_v34 = vmul.f32 %v4165_v30, %v2087_v29  ;;  %1896 = vst.msk [vmem:[#allocation2 + $0xe8] sm:$0xff] %vm287_vm0, %v1767_v22  ;;  %v2422_v37 = vmax.f32 %v2294_v24, 0.0  ;;  %v449_v57 = vld [vmem:[#allocation2 + $0x108] sm:$0xff]  ;;  %v454_v28 = vld [vmem:[#allocation2 + $0x130] sm:$0xff] }
 0x1a5   : > { %1960 = vst.msk [vmem:[#allocation2 + $0x2e8] sm:$0xff] %vm287_vm0, %v1831_v23  ;;  %v2486_v38 = vmax.f32 %v2358_v25, 0.0  ;;  %v2295_v39 = vadd.f32 %v4167_v42, %v2160_v26  ;;  %v2359_v40 = vadd.f32 %v4167_v42, %v2224_v27  ;;  %v2420_v44 = vmax.f32 %v2292_v31, 0.0  ;;  %v513_v58 = vld [vmem:[#allocation2 + $0x308] sm:$0xff]  ;;  %v518_v29 = vld [vmem:[#allocation2 + $0x330] sm:$0xff] }
 0x1a6   : > { %v2484_v45 = vmax.f32 %v2356_v32, 0.0  ;;  %v2293_v30 = vadd.f32 %v4167_v42, %v2158_v33  ;;  %v2357_v46 = vadd.f32 %v4167_v42, %v2222_v34  ;;  %2550 = vst.msk [vmem:[%s4196_s25 + $0xd0] sm:$0xff] %vm287_vm0, %v2422_v37  ;;  %v1772_v53 = vadd.f32 %v3035_v47, %v450_v35  ;;  %v2028_v60 = vld [vmem:[#allocation2 + $0xf0] sm:$0xff]  ;;  %v4450_v2 = vld [vmem:[#allocation8] ss:$0 sm:$0xff]  ;;  %v452_v35 = vld [vmem:[#allocation2 + $0x120] sm:$0xff] }
 0x1a7   : > { %2614 = vst.msk [vmem:[%s4196_s25 + $0x2d0] sm:$0xff] %vm287_vm0, %v2486_v38  ;;  %v2423_v51 = vmax.f32 %v2295_v39, 0.0  ;;  %v2487_v52 = vmax.f32 %v2359_v40, 0.0  ;;  %v1836_v54 = vadd.f32 %v3099_v48, %v514_v36  ;;  %2548 = vst.msk [vmem:[%s4196_s25 + $0xc0] sm:$0xff] %vm287_vm0, %v2420_v44  ;;  %v1770_v62 = vadd.f32 %v1355_v55, %v448_v41  ;;  %v4464_v17 = vld [vmem:[#allocation9] ss:$0 sm:$0xff] }
 0x1a8   : > { %2612 = vst.msk [vmem:[%s4196_s25 + $0x2c0] sm:$0xff] %vm287_vm0, %v2484_v45  ;;  %v2421_v42 = vmax.f32 %v2293_v30, 0.0  ;;  %v2485_v59 = vmax.f32 %v2357_v46, 0.0  ;;  %v2092_v61 = vld [vmem:[#allocation2 + $0x2f0] sm:$0xff]  ;;  %v1834_v63 = vadd.f32 %v1611_v56, %v512_v43  ;;  %v2163_v3 = vmul.f32 %v4450_v2, %v2028_v60  ;;  %1901 = vst.msk [vmem:[#allocation2 + $0x110] sm:$0xff] %vm287_vm0, %v1772_v53  ;;  %v516_v36 = vld [vmem:[#allocation2 + $0x320] sm:$0xff] }
 0x1a9   : > { %2551 = vst.msk [vmem:[%s4196_s25 + $0xd8] sm:$0xff] %vm287_vm0, %v2423_v51  ;;  %2615 = vst.msk [vmem:[%s4196_s25 + $0x2d8] sm:$0xff] %vm287_vm0, %v2487_v52  ;;  %v2227_v4 = vmul.f32 %v4450_v2, %v2092_v61  ;;  %v2026_v5 = vld [vmem:[#allocation2 + $0xe0] sm:$0xff]  ;;  %v1773_v7 = vadd.f32 %v3036_v0, %v451_v49  ;;  %v1837_v8 = vadd.f32 %v3100_v1, %v515_v50  ;;  %v3039_v41 = vpop.f32.mrb[36].mxu0  ;;  %v3103_v43 = vpop.f32.mrb[36].mxu1  ;;  %v455_v44 = vld [vmem:[#allocation2 + $0x138] sm:$0xff] }
 0x1aa   : > { %v2090_v6 = vld [vmem:[#allocation2 + $0x2e0] sm:$0xff]  ;;  %1965 = vst.msk [vmem:[#allocation2 + $0x310] sm:$0xff] %vm287_vm0, %v1836_v54  ;;  %2549 = vst.msk [vmem:[%s4196_s25 + $0xc8] sm:$0xff] %vm287_vm0, %v2421_v42  ;;  %v2161_v11 = vmul.f32 %v4450_v2, %v2026_v5  ;;  %v2029_v13 = vld [vmem:[#allocation2 + $0xf8] sm:$0xff]  ;;  %v1771_v15 = vadd.f32 %v1358_v9, %v449_v57  ;;  %v1835_v16 = vadd.f32 %v1614_v10, %v513_v58  ;;  %v1371_v49 = vpop.f32.mrb[37].mxu0  ;;  %v1627_v50 = vpop.f32.mrb[37].mxu1 }
 0x1ab   : > { %2613 = vst.msk [vmem:[%s4196_s25 + $0x2c8] sm:$0xff] %vm287_vm0, %v2485_v59  ;;  %v2225_v12 = vmul.f32 %v4450_v2, %v2090_v6  ;;  %v2093_v14 = vld [vmem:[#allocation2 + $0x2f8] sm:$0xff]  ;;  %1899 = vst.msk [vmem:[#allocation2 + $0x100] sm:$0xff] %vm287_vm0, %v1770_v62  ;;  %v2298_v18 = vadd.f32 %v4464_v17, %v2163_v3  ;;  %v2362_v19 = vadd.f32 %v4464_v17, %v2227_v4  ;;  %v2027_v22 = vld [vmem:[#allocation2 + $0xe8] sm:$0xff]  ;;  %v3040_v42 = vpop.f32.mrb[38].mxu0  ;;  %v3104_v59 = vpop.f32.mrb[38].mxu1 }
 0x1ac   : > { %1963 = vst.msk [vmem:[#allocation2 + $0x300] sm:$0xff] %vm287_vm0, %v1834_v63  ;;  %v2164_v20 = vmul.f32 %v4450_v2, %v2029_v13  ;;  %v2228_v21 = vmul.f32 %v4450_v2, %v2093_v14  ;;  %v2091_v23 = vld [vmem:[#allocation2 + $0x2e8] sm:$0xff]  ;;  %1902 = vst.msk [vmem:[#allocation2 + $0x118] sm:$0xff] %vm287_vm0, %v1773_v7  ;;  %v2296_v24 = vadd.f32 %v4464_v17, %v2161_v11  ;;  %v519_v45 = vld [vmem:[#allocation2 + $0x338] sm:$0xff]  ;;  %v1374_v3 = vpop.f32.mrb[39].mxu0  ;;  %v1630_v4 = vpop.f32.mrb[39].mxu1 }
 0x1ad   : > { %1966 = vst.msk [vmem:[#allocation2 + $0x318] sm:$0xff] %vm287_vm0, %v1837_v8  ;;  %v2360_v25 = vadd.f32 %v4464_v17, %v2225_v12  ;;  %v2162_v26 = vmul.f32 %v4450_v2, %v2027_v22  ;;  %v2226_v27 = vmul.f32 %v4450_v2, %v2091_v23  ;;  %1900 = vst.msk [vmem:[#allocation2 + $0x108] sm:$0xff] %vm287_vm0, %v1771_v15  ;;  %v2426_v31 = vmax.f32 %v2298_v18, 0.0  ;;  %v453_v51 = vld [vmem:[#allocation2 + $0x128] sm:$0xff]  ;;  %v458_v22 = vld [vmem:[#allocation2 + $0x150] sm:$0xff] }
 0x1ae   : > { %1964 = vst.msk [vmem:[#allocation2 + $0x308] sm:$0xff] %vm287_vm0, %v1835_v16  ;;  %v2490_v32 = vmax.f32 %v2362_v19, 0.0  ;;  %v2299_v33 = vadd.f32 %v4464_v17, %v2164_v20  ;;  %v2363_v34 = vadd.f32 %v4464_v17, %v2228_v21  ;;  %v2424_v37 = vmax.f32 %v2296_v24, 0.0  ;;  %v517_v52 = vld [vmem:[#allocation2 + $0x328] sm:$0xff]  ;;  %v522_v23 = vld [vmem:[#allocation2 + $0x350] sm:$0xff] }
 0x1af   : > { %v2488_v38 = vmax.f32 %v2360_v25, 0.0  ;;  %v2297_v39 = vadd.f32 %v4464_v17, %v2162_v26  ;;  %v2361_v40 = vadd.f32 %v4464_v17, %v2226_v27  ;;  %2554 = vst.msk [vmem:[%s4196_s25 + $0xf0] sm:$0xff] %vm287_vm0, %v2426_v31  ;;  %v1776_v47 = vadd.f32 %v3039_v41, %v454_v28  ;;  %v2032_v55 = vld [vmem:[#allocation2 + $0x110] sm:$0xff]  ;;  %v456_v28 = vld [vmem:[#allocation2 + $0x140] sm:$0xff] }
 0x1b0   : > { %2618 = vst.msk [vmem:[%s4196_s25 + $0x2f0] sm:$0xff] %vm287_vm0, %v2490_v32  ;;  %v2427_v30 = vmax.f32 %v2299_v33, 0.0  ;;  %v2491_v46 = vmax.f32 %v2363_v34, 0.0  ;;  %v1840_v48 = vadd.f32 %v3103_v43, %v518_v29  ;;  %2552 = vst.msk [vmem:[%s4196_s25 + $0xe0] sm:$0xff] %vm287_vm0, %v2424_v37  ;;  %v1774_v57 = vadd.f32 %v1371_v49, %v452_v35  ;;  %v520_v29 = vld [vmem:[#allocation2 + $0x340] sm:$0xff]  ;;  %v3043_v35 = vpop.f32.mrb[40].mxu0 }
 0x1b1   : > { %2616 = vst.msk [vmem:[%s4196_s25 + $0x2e0] sm:$0xff] %vm287_vm0, %v2488_v38  ;;  %v2425_v53 = vmax.f32 %v2297_v39, 0.0  ;;  %v2489_v54 = vmax.f32 %v2361_v40, 0.0  ;;  %v2096_v56 = vld [vmem:[#allocation2 + $0x310] sm:$0xff]  ;;  %v1838_v58 = vadd.f32 %v1627_v50, %v516_v36  ;;  %v2167_v60 = vmul.f32 %v4450_v2, %v2032_v55  ;;  %1905 = vst.msk [vmem:[#allocation2 + $0x130] sm:$0xff] %vm287_vm0, %v1776_v47  ;;  %v3107_v36 = vpop.f32.mrb[40].mxu1 }
 0x1b2   : > { %2555 = vst.msk [vmem:[%s4196_s25 + $0xf8] sm:$0xff] %vm287_vm0, %v2427_v30  ;;  %2619 = vst.msk [vmem:[%s4196_s25 + $0x2f8] sm:$0xff] %vm287_vm0, %v2491_v46  ;;  %v2231_v61 = vmul.f32 %v4450_v2, %v2096_v56  ;;  %v2030_v62 = vld [vmem:[#allocation2 + $0x100] sm:$0xff]  ;;  %v1777_v0 = vadd.f32 %v3040_v42, %v455_v44  ;;  %v1841_v1 = vadd.f32 %v3104_v59, %v519_v45  ;;  %v459_v37 = vld [vmem:[#allocation2 + $0x158] sm:$0xff]  ;;  %v1387_v44 = vpop.f32.mrb[41].mxu0  ;;  %v1643_v45 = vpop.f32.mrb[41].mxu1 }
 0x1b3   : > { %v2094_v63 = vld [vmem:[#allocation2 + $0x300] sm:$0xff]  ;;  %1969 = vst.msk [vmem:[#allocation2 + $0x330] sm:$0xff] %vm287_vm0, %v1840_v48  ;;  %2553 = vst.msk [vmem:[%s4196_s25 + $0xe8] sm:$0xff] %vm287_vm0, %v2425_v53  ;;  %v2165_v5 = vmul.f32 %v4450_v2, %v2030_v62  ;;  %v2033_v7 = vld [vmem:[#allocation2 + $0x118] sm:$0xff]  ;;  %v1775_v9 = vadd.f32 %v1374_v3, %v453_v51  ;;  %v1839_v10 = vadd.f32 %v1630_v4, %v517_v52  ;;  %v3044_v53 = vpop.f32.mrb[42].mxu0 }
 0x1b4   : > { %2617 = vst.msk [vmem:[%s4196_s25 + $0x2e8] sm:$0xff] %vm287_vm0, %v2489_v54  ;;  %v2229_v6 = vmul.f32 %v4450_v2, %v2094_v63  ;;  %v2097_v8 = vld [vmem:[#allocation2 + $0x318] sm:$0xff]  ;;  %1903 = vst.msk [vmem:[#allocation2 + $0x120] sm:$0xff] %vm287_vm0, %v1774_v57  ;;  %v2302_v11 = vadd.f32 %v4464_v17, %v2167_v60  ;;  %v2366_v12 = vadd.f32 %v4464_v17, %v2231_v61  ;;  %v2031_v15 = vld [vmem:[#allocation2 + $0x108] sm:$0xff]  ;;  %v3108_v54 = vpop.f32.mrb[42].mxu1  ;;  %v1390_v60 = vpop.f32.mrb[43].mxu0 }
 0x1b5   : > { %1967 = vst.msk [vmem:[#allocation2 + $0x320] sm:$0xff] %vm287_vm0, %v1838_v58  ;;  %v2168_v13 = vmul.f32 %v4450_v2, %v2033_v7  ;;  %v2232_v14 = vmul.f32 %v4450_v2, %v2097_v8  ;;  %v2095_v16 = vld [vmem:[#allocation2 + $0x308] sm:$0xff]  ;;  %1906 = vst.msk [vmem:[#allocation2 + $0x138] sm:$0xff] %vm287_vm0, %v1777_v0  ;;  %v2300_v18 = vadd.f32 %v4464_v17, %v2165_v5  ;;  %v523_v38 = vld [vmem:[#allocation2 + $0x358] sm:$0xff]  ;;  %v1646_v61 = vpop.f32.mrb[43].mxu1 }
 0x1b6   : > { %1970 = vst.msk [vmem:[#allocation2 + $0x338] sm:$0xff] %vm287_vm0, %v1841_v1  ;;  %v2364_v19 = vadd.f32 %v4464_v17, %v2229_v6  ;;  %v2166_v20 = vmul.f32 %v4450_v2, %v2031_v15  ;;  %v2230_v21 = vmul.f32 %v4450_v2, %v2095_v16  ;;  %1904 = vst.msk [vmem:[#allocation2 + $0x128] sm:$0xff] %vm287_vm0, %v1775_v9  ;;  %v2430_v24 = vmax.f32 %v2302_v11, 0.0  ;;  %v457_v30 = vld [vmem:[#allocation2 + $0x148] sm:$0xff]  ;;  %v462_v15 = vld [vmem:[#allocation2 + $0x170] sm:$0xff] }
 0x1b7   : > { %1968 = vst.msk [vmem:[#allocation2 + $0x328] sm:$0xff] %vm287_vm0, %v1839_v10  ;;  %v2494_v25 = vmax.f32 %v2366_v12, 0.0  ;;  %v2303_v26 = vadd.f32 %v4464_v17, %v2168_v13  ;;  %v2367_v27 = vadd.f32 %v4464_v17, %v2232_v14  ;;  %v2428_v31 = vmax.f32 %v2300_v18, 0.0  ;;  %v521_v46 = vld [vmem:[#allocation2 + $0x348] sm:$0xff]  ;;  %v526_v16 = vld [vmem:[#allocation2 + $0x370] sm:$0xff] }
 0x1b8   : > { %v2492_v32 = vmax.f32 %v2364_v19, 0.0  ;;  %v2301_v33 = vadd.f32 %v4464_v17, %v2166_v20  ;;  %v2365_v34 = vadd.f32 %v4464_v17, %v2230_v21  ;;  %2558 = vst.msk [vmem:[%s4196_s25 + $0x110] sm:$0xff] %vm287_vm0, %v2430_v24  ;;  %v1780_v41 = vadd.f32 %v3043_v35, %v458_v22  ;;  %v2036_v49 = vld [vmem:[#allocation2 + $0x130] sm:$0xff]  ;;  %v460_v22 = vld [vmem:[#allocation2 + $0x160] sm:$0xff] }
 0x1b9   : > { %2622 = vst.msk [vmem:[%s4196_s25 + $0x310] sm:$0xff] %vm287_vm0, %v2494_v25  ;;  %v2431_v39 = vmax.f32 %v2303_v26, 0.0  ;;  %v2495_v40 = vmax.f32 %v2367_v27, 0.0  ;;  %v1844_v43 = vadd.f32 %v3107_v36, %v522_v23  ;;  %2556 = vst.msk [vmem:[%s4196_s25 + $0x100] sm:$0xff] %vm287_vm0, %v2428_v31  ;;  %v1778_v51 = vadd.f32 %v1387_v44, %v456_v28  ;;  %v524_v23 = vld [vmem:[#allocation2 + $0x360] sm:$0xff]  ;;  %v3047_v28 = vpop.f32.mrb[44].mxu0 }
 0x1ba   : > { %2620 = vst.msk [vmem:[%s4196_s25 + $0x300] sm:$0xff] %vm287_vm0, %v2492_v32  ;;  %v2429_v47 = vmax.f32 %v2301_v33, 0.0  ;;  %v2493_v48 = vmax.f32 %v2365_v34, 0.0  ;;  %v2100_v50 = vld [vmem:[#allocation2 + $0x330] sm:$0xff]  ;;  %v1842_v52 = vadd.f32 %v1643_v45, %v520_v29  ;;  %v2171_v55 = vmul.f32 %v4450_v2, %v2036_v49  ;;  %1909 = vst.msk [vmem:[#allocation2 + $0x150] sm:$0xff] %vm287_vm0, %v1780_v41  ;;  %v3111_v29 = vpop.f32.mrb[44].mxu1 }
 0x1bb   : > { %2559 = vst.msk [vmem:[%s4196_s25 + $0x118] sm:$0xff] %vm287_vm0, %v2431_v39  ;;  %2623 = vst.msk [vmem:[%s4196_s25 + $0x318] sm:$0xff] %vm287_vm0, %v2495_v40  ;;  %v2235_v56 = vmul.f32 %v4450_v2, %v2100_v50  ;;  %v2034_v57 = vld [vmem:[#allocation2 + $0x120] sm:$0xff]  ;;  %v1781_v42 = vadd.f32 %v3044_v53, %v459_v37  ;;  %v1845_v59 = vadd.f32 %v3108_v54, %v523_v38  ;;  %v463_v31 = vld [vmem:[#allocation2 + $0x178] sm:$0xff]  ;;  %v1403_v37 = vpop.f32.mrb[45].mxu0  ;;  %v1659_v38 = vpop.f32.mrb[45].mxu1 }
 0x1bc   : > { %v2098_v58 = vld [vmem:[#allocation2 + $0x320] sm:$0xff]  ;;  %1973 = vst.msk [vmem:[#allocation2 + $0x350] sm:$0xff] %vm287_vm0, %v1844_v43  ;;  %2557 = vst.msk [vmem:[%s4196_s25 + $0x108] sm:$0xff] %vm287_vm0, %v2429_v47  ;;  %v2169_v62 = vmul.f32 %v4450_v2, %v2034_v57  ;;  %v2037_v0 = vld [vmem:[#allocation2 + $0x138] sm:$0xff]  ;;  %v1779_v3 = vadd.f32 %v1390_v60, %v457_v30  ;;  %v1843_v4 = vadd.f32 %v1646_v61, %v521_v46  ;;  %v3048_v47 = vpop.f32.mrb[46].mxu0 }
 0x1bd   : > { %2621 = vst.msk [vmem:[%s4196_s25 + $0x308] sm:$0xff] %vm287_vm0, %v2493_v48  ;;  %v2233_v63 = vmul.f32 %v4450_v2, %v2098_v58  ;;  %v2101_v1 = vld [vmem:[#allocation2 + $0x338] sm:$0xff]  ;;  %1907 = vst.msk [vmem:[#allocation2 + $0x140] sm:$0xff] %vm287_vm0, %v1778_v51  ;;  %v2306_v5 = vadd.f32 %v4464_v17, %v2171_v55  ;;  %v2370_v6 = vadd.f32 %v4464_v17, %v2235_v56  ;;  %v2035_v9 = vld [vmem:[#allocation2 + $0x128] sm:$0xff]  ;;  %v3112_v48 = vpop.f32.mrb[46].mxu1  ;;  %v1406_v55 = vpop.f32.mrb[47].mxu0 }
 0x1be   : > { %1971 = vst.msk [vmem:[#allocation2 + $0x340] sm:$0xff] %vm287_vm0, %v1842_v52  ;;  %v2172_v7 = vmul.f32 %v4450_v2, %v2037_v0  ;;  %v2236_v8 = vmul.f32 %v4450_v2, %v2101_v1  ;;  %v2099_v10 = vld [vmem:[#allocation2 + $0x328] sm:$0xff]  ;;  %1910 = vst.msk [vmem:[#allocation2 + $0x158] sm:$0xff] %vm287_vm0, %v1781_v42  ;;  %v2304_v11 = vadd.f32 %v4464_v17, %v2169_v62  ;;  %v527_v32 = vld [vmem:[#allocation2 + $0x378] sm:$0xff]  ;;  %v1662_v56 = vpop.f32.mrb[47].mxu1 }
 0x1bf   : > { %1974 = vst.msk [vmem:[#allocation2 + $0x358] sm:$0xff] %vm287_vm0, %v1845_v59  ;;  %v2368_v12 = vadd.f32 %v4464_v17, %v2233_v63  ;;  %v2170_v13 = vmul.f32 %v4450_v2, %v2035_v9  ;;  %v2234_v14 = vmul.f32 %v4450_v2, %v2099_v10  ;;  %1908 = vst.msk [vmem:[#allocation2 + $0x148] sm:$0xff] %vm287_vm0, %v1779_v3  ;;  %v2434_v18 = vmax.f32 %v2306_v5, 0.0  ;;  %v461_v39 = vld [vmem:[#allocation2 + $0x168] sm:$0xff]  ;;  %v466_v9 = vld [vmem:[#allocation2 + $0x190] sm:$0xff] }
 0x1c0   : > { %1972 = vst.msk [vmem:[#allocation2 + $0x348] sm:$0xff] %vm287_vm0, %v1843_v4  ;;  %v2498_v19 = vmax.f32 %v2370_v6, 0.0  ;;  %v2307_v20 = vadd.f32 %v4464_v17, %v2172_v7  ;;  %v2371_v21 = vadd.f32 %v4464_v17, %v2236_v8  ;;  %v2432_v24 = vmax.f32 %v2304_v11, 0.0  ;;  %v525_v40 = vld [vmem:[#allocation2 + $0x368] sm:$0xff]  ;;  %v530_v10 = vld [vmem:[#allocation2 + $0x390] sm:$0xff] }
 0x1c1   : > { %v2496_v25 = vmax.f32 %v2368_v12, 0.0  ;;  %v2305_v26 = vadd.f32 %v4464_v17, %v2170_v13  ;;  %v2369_v27 = vadd.f32 %v4464_v17, %v2234_v14  ;;  %2562 = vst.msk [vmem:[%s4196_s25 + $0x130] sm:$0xff] %vm287_vm0, %v2434_v18  ;;  %v1784_v35 = vadd.f32 %v3047_v28, %v462_v15  ;;  %v2040_v44 = vld [vmem:[#allocation2 + $0x150] sm:$0xff]  ;;  %v464_v15 = vld [vmem:[#allocation2 + $0x180] sm:$0xff] }
 0x1c2   : > { %2626 = vst.msk [vmem:[%s4196_s25 + $0x330] sm:$0xff] %vm287_vm0, %v2498_v19  ;;  %v2435_v33 = vmax.f32 %v2307_v20, 0.0  ;;  %v2499_v34 = vmax.f32 %v2371_v21, 0.0  ;;  %v1848_v36 = vadd.f32 %v3111_v29, %v526_v16  ;;  %2560 = vst.msk [vmem:[%s4196_s25 + $0x120] sm:$0xff] %vm287_vm0, %v2432_v24  ;;  %v1782_v30 = vadd.f32 %v1403_v37, %v460_v22  ;;  %v528_v16 = vld [vmem:[#allocation2 + $0x380] sm:$0xff]  ;;  %v3051_v22 = vpop.f32.mrb[48].mxu0 }
 0x1c3   : > { %2624 = vst.msk [vmem:[%s4196_s25 + $0x320] sm:$0xff] %vm287_vm0, %v2496_v25  ;;  %v2433_v41 = vmax.f32 %v2305_v26, 0.0  ;;  %v2497_v43 = vmax.f32 %v2369_v27, 0.0  ;;  %v2104_v45 = vld [vmem:[#allocation2 + $0x350] sm:$0xff]  ;;  %v1846_v46 = vadd.f32 %v1659_v38, %v524_v23  ;;  %v2175_v49 = vmul.f32 %v4450_v2, %v2040_v44  ;;  %1913 = vst.msk [vmem:[#allocation2 + $0x170] sm:$0xff] %vm287_vm0, %v1784_v35  ;;  %v3115_v23 = vpop.f32.mrb[48].mxu1 }
 0x1c4   : > { %2563 = vst.msk [vmem:[%s4196_s25 + $0x138] sm:$0xff] %vm287_vm0, %v2435_v33  ;;  %2627 = vst.msk [vmem:[%s4196_s25 + $0x338] sm:$0xff] %vm287_vm0, %v2499_v34  ;;  %v2239_v50 = vmul.f32 %v4450_v2, %v2104_v45  ;;  %v2038_v51 = vld [vmem:[#allocation2 + $0x140] sm:$0xff]  ;;  %v1785_v53 = vadd.f32 %v3048_v47, %v463_v31  ;;  %v1849_v54 = vadd.f32 %v3112_v48, %v527_v32  ;;  %v467_v24 = vld [vmem:[#allocation2 + $0x198] sm:$0xff]  ;;  %v1419_v31 = vpop.f32.mrb[49].mxu0  ;;  %v1675_v32 = vpop.f32.mrb[49].mxu1 }
 0x1c5   : > { %v2102_v52 = vld [vmem:[#allocation2 + $0x340] sm:$0xff]  ;;  %1977 = vst.msk [vmem:[#allocation2 + $0x370] sm:$0xff] %vm287_vm0, %v1848_v36  ;;  %2561 = vst.msk [vmem:[%s4196_s25 + $0x128] sm:$0xff] %vm287_vm0, %v2433_v41  ;;  %v2173_v57 = vmul.f32 %v4450_v2, %v2038_v51  ;;  %v2041_v42 = vld [vmem:[#allocation2 + $0x158] sm:$0xff]  ;;  %v1783_v60 = vadd.f32 %v1406_v55, %v461_v39  ;;  %v1847_v61 = vadd.f32 %v1662_v56, %v525_v40  ;;  %v3052_v41 = vpop.f32.mrb[50].mxu0 }
 0x1c6   : > { %2625 = vst.msk [vmem:[%s4196_s25 + $0x328] sm:$0xff] %vm287_vm0, %v2497_v43  ;;  %v2237_v58 = vmul.f32 %v4450_v2, %v2102_v52  ;;  %v2105_v59 = vld [vmem:[#allocation2 + $0x358] sm:$0xff]  ;;  %1911 = vst.msk [vmem:[#allocation2 + $0x160] sm:$0xff] %vm287_vm0, %v1782_v30  ;;  %v2310_v62 = vadd.f32 %v4464_v17, %v2175_v49  ;;  %v2374_v63 = vadd.f32 %v4464_v17, %v2239_v50  ;;  %v2039_v3 = vld [vmem:[#allocation2 + $0x148] sm:$0xff]  ;;  %v3116_v43 = vpop.f32.mrb[50].mxu1  ;;  %v1422_v49 = vpop.f32.mrb[51].mxu0 }
 0x1c7   : > { %1975 = vst.msk [vmem:[#allocation2 + $0x360] sm:$0xff] %vm287_vm0, %v1846_v46  ;;  %v2176_v0 = vmul.f32 %v4450_v2, %v2041_v42  ;;  %v2240_v1 = vmul.f32 %v4450_v2, %v2105_v59  ;;  %v2103_v4 = vld [vmem:[#allocation2 + $0x348] sm:$0xff]  ;;  %1914 = vst.msk [vmem:[#allocation2 + $0x178] sm:$0xff] %vm287_vm0, %v1785_v53  ;;  %v2308_v5 = vadd.f32 %v4464_v17, %v2173_v57  ;;  %v531_v25 = vld [vmem:[#allocation2 + $0x398] sm:$0xff]  ;;  %v1678_v50 = vpop.f32.mrb[51].mxu1 }
 0x1c8   : > { %1978 = vst.msk [vmem:[#allocation2 + $0x378] sm:$0xff] %vm287_vm0, %v1849_v54  ;;  %v2372_v6 = vadd.f32 %v4464_v17, %v2237_v58  ;;  %v2174_v7 = vmul.f32 %v4450_v2, %v2039_v3  ;;  %v2238_v8 = vmul.f32 %v4450_v2, %v2103_v4  ;;  %1912 = vst.msk [vmem:[#allocation2 + $0x168] sm:$0xff] %vm287_vm0, %v1783_v60  ;;  %v2438_v11 = vmax.f32 %v2310_v62, 0.0  ;;  %v465_v33 = vld [vmem:[#allocation2 + $0x188] sm:$0xff]  ;;  %v470_v3 = vld [vmem:[#allocation2 + $0x1b0] sm:$0xff] }
 0x1c9   : > { %1976 = vst.msk [vmem:[#allocation2 + $0x368] sm:$0xff] %vm287_vm0, %v1847_v61  ;;  %v2502_v12 = vmax.f32 %v2374_v63, 0.0  ;;  %v2311_v13 = vadd.f32 %v4464_v17, %v2176_v0  ;;  %v2375_v14 = vadd.f32 %v4464_v17, %v2240_v1  ;;  %v2436_v18 = vmax.f32 %v2308_v5, 0.0  ;;  %v529_v34 = vld [vmem:[#allocation2 + $0x388] sm:$0xff]  ;;  %v534_v4 = vld [vmem:[#allocation2 + $0x3b0] sm:$0xff] }
 0x1ca   : > { %v2500_v19 = vmax.f32 %v2372_v6, 0.0  ;;  %v2309_v20 = vadd.f32 %v4464_v17, %v2174_v7  ;;  %v2373_v21 = vadd.f32 %v4464_v17, %v2238_v8  ;;  %2566 = vst.msk [vmem:[%s4196_s25 + $0x150] sm:$0xff] %vm287_vm0, %v2438_v11  ;;  %v1788_v28 = vadd.f32 %v3051_v22, %v466_v9  ;;  %v2044_v37 = vld [vmem:[#allocation2 + $0x170] sm:$0xff]  ;;  %v468_v9 = vld [vmem:[#allocation2 + $0x1a0] sm:$0xff] }
 0x1cb   : > { %2630 = vst.msk [vmem:[%s4196_s25 + $0x350] sm:$0xff] %vm287_vm0, %v2502_v12  ;;  %v2439_v26 = vmax.f32 %v2311_v13, 0.0  ;;  %v2503_v27 = vmax.f32 %v2375_v14, 0.0  ;;  %v1852_v29 = vadd.f32 %v3115_v23, %v530_v10  ;;  %2564 = vst.msk [vmem:[%s4196_s25 + $0x140] sm:$0xff] %vm287_vm0, %v2436_v18  ;;  %v1786_v39 = vadd.f32 %v1419_v31, %v464_v15  ;;  %v532_v10 = vld [vmem:[#allocation2 + $0x3a0] sm:$0xff]  ;;  %v3055_v15 = vpop.f32.mrb[52].mxu0 }
 0x1cc   : > { %2628 = vst.msk [vmem:[%s4196_s25 + $0x340] sm:$0xff] %vm287_vm0, %v2500_v19  ;;  %v2437_v35 = vmax.f32 %v2309_v20, 0.0  ;;  %v2501_v36 = vmax.f32 %v2373_v21, 0.0  ;;  %v2108_v38 = vld [vmem:[#allocation2 + $0x370] sm:$0xff]  ;;  %v1850_v40 = vadd.f32 %v1675_v32, %v528_v16  ;;  %v2179_v44 = vmul.f32 %v4450_v2, %v2044_v37  ;;  %1917 = vst.msk [vmem:[#allocation2 + $0x190] sm:$0xff] %vm287_vm0, %v1788_v28  ;;  %v3119_v16 = vpop.f32.mrb[52].mxu1 }
 0x1cd   : > { %2567 = vst.msk [vmem:[%s4196_s25 + $0x158] sm:$0xff] %vm287_vm0, %v2439_v26  ;;  %2631 = vst.msk [vmem:[%s4196_s25 + $0x358] sm:$0xff] %vm287_vm0, %v2503_v27  ;;  %v2243_v45 = vmul.f32 %v4450_v2, %v2108_v38  ;;  %v2042_v30 = vld [vmem:[#allocation2 + $0x160] sm:$0xff]  ;;  %v1789_v47 = vadd.f32 %v3052_v41, %v467_v24  ;;  %v1853_v48 = vadd.f32 %v3116_v43, %v531_v25  ;;  %v471_v18 = vld [vmem:[#allocation2 + $0x1b8] sm:$0xff]  ;;  %v1435_v24 = vpop.f32.mrb[53].mxu0  ;;  %v1691_v25 = vpop.f32.mrb[53].mxu1 }
 0x1ce   : > { %v2106_v46 = vld [vmem:[#allocation2 + $0x360] sm:$0xff]  ;;  %1981 = vst.msk [vmem:[#allocation2 + $0x390] sm:$0xff] %vm287_vm0, %v1852_v29  ;;  %2565 = vst.msk [vmem:[%s4196_s25 + $0x148] sm:$0xff] %vm287_vm0, %v2437_v35  ;;  %v2177_v51 = vmul.f32 %v4450_v2, %v2042_v30  ;;  %v2045_v53 = vld [vmem:[#allocation2 + $0x178] sm:$0xff]  ;;  %v1787_v55 = vadd.f32 %v1422_v49, %v465_v33  ;;  %v1851_v56 = vadd.f32 %v1678_v50, %v529_v34  ;;  %v3056_v35 = vpop.f32.mrb[54].mxu0 }
 0x1cf   : > { %2629 = vst.msk [vmem:[%s4196_s25 + $0x348] sm:$0xff] %vm287_vm0, %v2501_v36  ;;  %v2241_v52 = vmul.f32 %v4450_v2, %v2106_v46  ;;  %v2109_v54 = vld [vmem:[#allocation2 + $0x378] sm:$0xff]  ;;  %1915 = vst.msk [vmem:[#allocation2 + $0x180] sm:$0xff] %vm287_vm0, %v1786_v39  ;;  %v2314_v57 = vadd.f32 %v4464_v17, %v2179_v44  ;;  %v2378_v58 = vadd.f32 %v4464_v17, %v2243_v45  ;;  %v2043_v60 = vld [vmem:[#allocation2 + $0x168] sm:$0xff]  ;;  %v3120_v36 = vpop.f32.mrb[54].mxu1  ;;  %v1438_v44 = vpop.f32.mrb[55].mxu0 }
 0x1d0   : > { %1979 = vst.msk [vmem:[#allocation2 + $0x380] sm:$0xff] %vm287_vm0, %v1850_v40  ;;  %v2180_v42 = vmul.f32 %v4450_v2, %v2045_v53  ;;  %v2244_v59 = vmul.f32 %v4450_v2, %v2109_v54  ;;  %v2107_v61 = vld [vmem:[#allocation2 + $0x368] sm:$0xff]  ;;  %1918 = vst.msk [vmem:[#allocation2 + $0x198] sm:$0xff] %vm287_vm0, %v1789_v47  ;;  %v2312_v62 = vadd.f32 %v4464_v17, %v2177_v51  ;;  %v535_v19 = vld [vmem:[#allocation2 + $0x3b8] sm:$0xff]  ;;  %v1694_v45 = vpop.f32.mrb[55].mxu1 }
 0x1d1   : > { %1982 = vst.msk [vmem:[#allocation2 + $0x398] sm:$0xff] %vm287_vm0, %v1853_v48  ;;  %v2376_v63 = vadd.f32 %v4464_v17, %v2241_v52  ;;  %v2178_v0 = vmul.f32 %v4450_v2, %v2043_v60  ;;  %v2242_v1 = vmul.f32 %v4450_v2, %v2107_v61  ;;  %1916 = vst.msk [vmem:[#allocation2 + $0x188] sm:$0xff] %vm287_vm0, %v1787_v55  ;;  %v2442_v5 = vmax.f32 %v2314_v57, 0.0  ;;  %v469_v26 = vld [vmem:[#allocation2 + $0x1a8] sm:$0xff]  ;;  %v474_v60 = vld [vmem:[#allocation2 + $0x1d0] sm:$0xff] }
 0x1d2   : > { %1980 = vst.msk [vmem:[#allocation2 + $0x388] sm:$0xff] %vm287_vm0, %v1851_v56  ;;  %v2506_v6 = vmax.f32 %v2378_v58, 0.0  ;;  %v2315_v7 = vadd.f32 %v4464_v17, %v2180_v42  ;;  %v2379_v8 = vadd.f32 %v4464_v17, %v2244_v59  ;;  %v2440_v11 = vmax.f32 %v2312_v62, 0.0  ;;  %v533_v27 = vld [vmem:[#allocation2 + $0x3a8] sm:$0xff]  ;;  %v538_v61 = vld [vmem:[#allocation2 + $0x3d0] sm:$0xff] }
 0x1d3   : > { %v2504_v12 = vmax.f32 %v2376_v63, 0.0  ;;  %v2313_v13 = vadd.f32 %v4464_v17, %v2178_v0  ;;  %v2377_v14 = vadd.f32 %v4464_v17, %v2242_v1  ;;  %2570 = vst.msk [vmem:[%s4196_s25 + $0x170] sm:$0xff] %vm287_vm0, %v2442_v5  ;;  %v1792_v22 = vadd.f32 %v3055_v15, %v470_v3  ;;  %v2048_v31 = vld [vmem:[#allocation2 + $0x190] sm:$0xff]  ;;  %v472_v3 = vld [vmem:[#allocation2 + $0x1c0] sm:$0xff] }
 0x1d4   : > { %2634 = vst.msk [vmem:[%s4196_s25 + $0x370] sm:$0xff] %vm287_vm0, %v2506_v6  ;;  %v2443_v20 = vmax.f32 %v2315_v7, 0.0  ;;  %v2507_v21 = vmax.f32 %v2379_v8, 0.0  ;;  %v1856_v23 = vadd.f32 %v3119_v16, %v534_v4  ;;  %2568 = vst.msk [vmem:[%s4196_s25 + $0x160] sm:$0xff] %vm287_vm0, %v2440_v11  ;;  %v1790_v33 = vadd.f32 %v1435_v24, %v468_v9  ;;  %v536_v4 = vld [vmem:[#allocation2 + $0x3c0] sm:$0xff]  ;;  %v3059_v9 = vpop.f32.mrb[56].mxu0 }
 0x1d5   : > { %2632 = vst.msk [vmem:[%s4196_s25 + $0x360] sm:$0xff] %vm287_vm0, %v2504_v12  ;;  %v2441_v28 = vmax.f32 %v2313_v13, 0.0  ;;  %v2505_v29 = vmax.f32 %v2377_v14, 0.0  ;;  %v2112_v32 = vld [vmem:[#allocation2 + $0x390] sm:$0xff]  ;;  %v1854_v34 = vadd.f32 %v1691_v25, %v532_v10  ;;  %v2183_v37 = vmul.f32 %v4450_v2, %v2048_v31  ;;  %1921 = vst.msk [vmem:[#allocation2 + $0x1b0] sm:$0xff] %vm287_vm0, %v1792_v22  ;;  %v3123_v10 = vpop.f32.mrb[56].mxu1 }
 0x1d6   : > { %2571 = vst.msk [vmem:[%s4196_s25 + $0x178] sm:$0xff] %vm287_vm0, %v2443_v20  ;;  %2635 = vst.msk [vmem:[%s4196_s25 + $0x378] sm:$0xff] %vm287_vm0, %v2507_v21  ;;  %v2247_v38 = vmul.f32 %v4450_v2, %v2112_v32  ;;  %v2046_v39 = vld [vmem:[#allocation2 + $0x180] sm:$0xff]  ;;  %v1793_v41 = vadd.f32 %v3056_v35, %v471_v18  ;;  %v1857_v43 = vadd.f32 %v3120_v36, %v535_v19  ;;  %v475_v11 = vld [vmem:[#allocation2 + $0x1d8] sm:$0xff]  ;;  %v1451_v18 = vpop.f32.mrb[57].mxu0  ;;  %v1707_v19 = vpop.f32.mrb[57].mxu1 }
 0x1d7   : > { %v2110_v40 = vld [vmem:[#allocation2 + $0x380] sm:$0xff]  ;;  %1985 = vst.msk [vmem:[#allocation2 + $0x3b0] sm:$0xff] %vm287_vm0, %v1856_v23  ;;  %2569 = vst.msk [vmem:[%s4196_s25 + $0x168] sm:$0xff] %vm287_vm0, %v2441_v28  ;;  %v2181_v30 = vmul.f32 %v4450_v2, %v2046_v39  ;;  %v2049_v47 = vld [vmem:[#allocation2 + $0x198] sm:$0xff]  ;;  %v1791_v49 = vadd.f32 %v1438_v44, %v469_v26  ;;  %v1855_v50 = vadd.f32 %v1694_v45, %v533_v27  ;;  %v3060_v28 = vpop.f32.mrb[58].mxu0 }
 0x1d8   : > { %2633 = vst.msk [vmem:[%s4196_s25 + $0x368] sm:$0xff] %vm287_vm0, %v2505_v29  ;;  %v2245_v46 = vmul.f32 %v4450_v2, %v2110_v40  ;;  %v2113_v48 = vld [vmem:[#allocation2 + $0x398] sm:$0xff]  ;;  %1919 = vst.msk [vmem:[#allocation2 + $0x1a0] sm:$0xff] %vm287_vm0, %v1790_v33  ;;  %v2318_v51 = vadd.f32 %v4464_v17, %v2183_v37  ;;  %v2382_v52 = vadd.f32 %v4464_v17, %v2247_v38  ;;  %v2047_v55 = vld [vmem:[#allocation2 + $0x188] sm:$0xff]  ;;  %v3124_v29 = vpop.f32.mrb[58].mxu1  ;;  %v1454_v37 = vpop.f32.mrb[59].mxu0 }
 0x1d9   : > { %1983 = vst.msk [vmem:[#allocation2 + $0x3a0] sm:$0xff] %vm287_vm0, %v1854_v34  ;;  %v2184_v53 = vmul.f32 %v4450_v2, %v2049_v47  ;;  %v2248_v54 = vmul.f32 %v4450_v2, %v2113_v48  ;;  %v2111_v56 = vld [vmem:[#allocation2 + $0x388] sm:$0xff]  ;;  %1922 = vst.msk [vmem:[#allocation2 + $0x1b8] sm:$0xff] %vm287_vm0, %v1793_v41  ;;  %v2316_v57 = vadd.f32 %v4464_v17, %v2181_v30  ;;  %v539_v12 = vld [vmem:[#allocation2 + $0x3d8] sm:$0xff]  ;;  %v1710_v38 = vpop.f32.mrb[59].mxu1 }
 0x1da   : > { %1986 = vst.msk [vmem:[#allocation2 + $0x3b8] sm:$0xff] %vm287_vm0, %v1857_v43  ;;  %v2380_v58 = vadd.f32 %v4464_v17, %v2245_v46  ;;  %v2182_v42 = vmul.f32 %v4450_v2, %v2047_v55  ;;  %v2246_v59 = vmul.f32 %v4450_v2, %v2111_v56  ;;  %1920 = vst.msk [vmem:[#allocation2 + $0x1a8] sm:$0xff] %vm287_vm0, %v1791_v49  ;;  %v2446_v62 = vmax.f32 %v2318_v51, 0.0  ;;  %v473_v20 = vld [vmem:[#allocation2 + $0x1c8] sm:$0xff]  ;;  %v478_v55 = vld [vmem:[#allocation2 + $0x1f0] sm:$0xff] }
 0x1db   : > { %1984 = vst.msk [vmem:[#allocation2 + $0x3a8] sm:$0xff] %vm287_vm0, %v1855_v50  ;;  %v2510_v63 = vmax.f32 %v2382_v52, 0.0  ;;  %v2319_v0 = vadd.f32 %v4464_v17, %v2184_v53  ;;  %v2383_v1 = vadd.f32 %v4464_v17, %v2248_v54  ;;  %v2444_v5 = vmax.f32 %v2316_v57, 0.0  ;;  %v537_v21 = vld [vmem:[#allocation2 + $0x3c8] sm:$0xff]  ;;  %v542_v56 = vld [vmem:[#allocation2 + $0x3f0] sm:$0xff] }
 0x1dc   : > { %v2508_v6 = vmax.f32 %v2380_v58, 0.0  ;;  %v2317_v7 = vadd.f32 %v4464_v17, %v2182_v42  ;;  %v2381_v8 = vadd.f32 %v4464_v17, %v2246_v59  ;;  %2574 = vst.msk [vmem:[%s4196_s25 + $0x190] sm:$0xff] %vm287_vm0, %v2446_v62  ;;  %v1796_v15 = vadd.f32 %v3059_v9, %v474_v60  ;;  %v2052_v24 = vld [vmem:[#allocation2 + $0x1b0] sm:$0xff]  ;;  %v476_v60 = vld [vmem:[#allocation2 + $0x1e0] sm:$0xff] }
 0x1dd   : > { %2638 = vst.msk [vmem:[%s4196_s25 + $0x390] sm:$0xff] %vm287_vm0, %v2510_v63  ;;  %v2447_v13 = vmax.f32 %v2319_v0, 0.0  ;;  %v2511_v14 = vmax.f32 %v2383_v1, 0.0  ;;  %v1860_v16 = vadd.f32 %v3123_v10, %v538_v61  ;;  %2572 = vst.msk [vmem:[%s4196_s25 + $0x180] sm:$0xff] %vm287_vm0, %v2444_v5  ;;  %v1794_v26 = vadd.f32 %v1451_v18, %v472_v3  ;;  %v540_v61 = vld [vmem:[#allocation2 + $0x3e0] sm:$0xff]  ;;  %v3063_v3 = vpop.f32.mrb[60].mxu0 }
 0x1de   : > { %2636 = vst.msk [vmem:[%s4196_s25 + $0x380] sm:$0xff] %vm287_vm0, %v2508_v6  ;;  %v2445_v22 = vmax.f32 %v2317_v7, 0.0  ;;  %v2509_v23 = vmax.f32 %v2381_v8, 0.0  ;;  %v2116_v25 = vld [vmem:[#allocation2 + $0x3b0] sm:$0xff]  ;;  %v1858_v27 = vadd.f32 %v1707_v19, %v536_v4  ;;  %v2187_v31 = vmul.f32 %v4450_v2, %v2052_v24  ;;  %1925 = vst.msk [vmem:[#allocation2 + $0x1d0] sm:$0xff] %vm287_vm0, %v1796_v15  ;;  %v3127_v4 = vpop.f32.mrb[60].mxu1 }
 0x1df   : > { %2575 = vst.msk [vmem:[%s4196_s25 + $0x198] sm:$0xff] %vm287_vm0, %v2447_v13  ;;  %2639 = vst.msk [vmem:[%s4196_s25 + $0x398] sm:$0xff] %vm287_vm0, %v2511_v14  ;;  %v2251_v32 = vmul.f32 %v4450_v2, %v2116_v25  ;;  %v2050_v33 = vld [vmem:[#allocation2 + $0x1a0] sm:$0xff]  ;;  %v1797_v35 = vadd.f32 %v3060_v28, %v475_v11  ;;  %v1861_v36 = vadd.f32 %v3124_v29, %v539_v12  ;;  %v479_v5 = vld [vmem:[#allocation2 + $0x1f8] sm:$0xff]  ;;  %v1467_v11 = vpop.f32.mrb[61].mxu0  ;;  %v1723_v12 = vpop.f32.mrb[61].mxu1 }
 0x1e0   : > { %v2114_v34 = vld [vmem:[#allocation2 + $0x3a0] sm:$0xff]  ;;  %1989 = vst.msk [vmem:[#allocation2 + $0x3d0] sm:$0xff] %vm287_vm0, %v1860_v16  ;;  %2573 = vst.msk [vmem:[%s4196_s25 + $0x188] sm:$0xff] %vm287_vm0, %v2445_v22  ;;  %v2185_v39 = vmul.f32 %v4450_v2, %v2050_v33  ;;  %v2053_v41 = vld [vmem:[#allocation2 + $0x1b8] sm:$0xff]  ;;  %v1795_v44 = vadd.f32 %v1454_v37, %v473_v20  ;;  %v1859_v45 = vadd.f32 %v1710_v38, %v537_v21  ;;  %v3064_v22 = vpop.f32.mrb[62].mxu0 }
 0x1e1   : > { %2637 = vst.msk [vmem:[%s4196_s25 + $0x388] sm:$0xff] %vm287_vm0, %v2509_v23  ;;  %v2249_v40 = vmul.f32 %v4450_v2, %v2114_v34  ;;  %v2117_v43 = vld [vmem:[#allocation2 + $0x3b8] sm:$0xff]  ;;  %1923 = vst.msk [vmem:[#allocation2 + $0x1c0] sm:$0xff] %vm287_vm0, %v1794_v26  ;;  %v2322_v30 = vadd.f32 %v4464_v17, %v2187_v31  ;;  %v2386_v46 = vadd.f32 %v4464_v17, %v2251_v32  ;;  %v2051_v49 = vld [vmem:[#allocation2 + $0x1a8] sm:$0xff]  ;;  %v3128_v23 = vpop.f32.mrb[62].mxu1  ;;  %v1470_v31 = vpop.f32.mrb[63].mxu0 }
 0x1e2   : > { %1987 = vst.msk [vmem:[#allocation2 + $0x3c0] sm:$0xff] %vm287_vm0, %v1858_v27  ;;  %v2188_v47 = vmul.f32 %v4450_v2, %v2053_v41  ;;  %v2252_v48 = vmul.f32 %v4450_v2, %v2117_v43  ;;  %v2115_v50 = vld [vmem:[#allocation2 + $0x3a8] sm:$0xff]  ;;  %1926 = vst.msk [vmem:[#allocation2 + $0x1d8] sm:$0xff] %vm287_vm0, %v1797_v35  ;;  %v2320_v51 = vadd.f32 %v4464_v17, %v2185_v39  ;;  %v543_v6 = vld [vmem:[#allocation2 + $0x3f8] sm:$0xff]  ;;  %v1726_v32 = vpop.f32.mrb[63].mxu1 }
 0x1e3   : > { %1990 = vst.msk [vmem:[#allocation2 + $0x3d8] sm:$0xff] %vm287_vm0, %v1861_v36  ;;  %v2384_v52 = vadd.f32 %v4464_v17, %v2249_v40  ;;  %v2186_v53 = vmul.f32 %v4450_v2, %v2051_v49  ;;  %v2250_v54 = vmul.f32 %v4450_v2, %v2115_v50  ;;  %1924 = vst.msk [vmem:[#allocation2 + $0x1c8] sm:$0xff] %vm287_vm0, %v1795_v44  ;;  %v2450_v57 = vmax.f32 %v2322_v30, 0.0  ;;  %v477_v13 = vld [vmem:[#allocation2 + $0x1e8] sm:$0xff] }
 0x1e4   : > { %1988 = vst.msk [vmem:[#allocation2 + $0x3c8] sm:$0xff] %vm287_vm0, %v1859_v45  ;;  %v2514_v58 = vmax.f32 %v2386_v46, 0.0  ;;  %v2323_v42 = vadd.f32 %v4464_v17, %v2188_v47  ;;  %v2387_v59 = vadd.f32 %v4464_v17, %v2252_v48  ;;  %v2448_v62 = vmax.f32 %v2320_v51, 0.0  ;;  %v541_v14 = vld [vmem:[#allocation2 + $0x3e8] sm:$0xff] }
 0x1e5   : > { %v2512_v63 = vmax.f32 %v2384_v52, 0.0  ;;  %v2321_v0 = vadd.f32 %v4464_v17, %v2186_v53  ;;  %v2385_v1 = vadd.f32 %v4464_v17, %v2250_v54  ;;  %2578 = vst.msk [vmem:[%s4196_s25 + $0x1b0] sm:$0xff] %vm287_vm0, %v2450_v57  ;;  %v1800_v9 = vadd.f32 %v3063_v3, %v478_v55  ;;  %v2056_v18 = vld [vmem:[#allocation2 + $0x1d0] sm:$0xff]  ;;  %v4742_v33 = vld [vmem:[#allocation8] ss:$0 sm:$0xff] }
 0x1e6   : > { %2642 = vst.msk [vmem:[%s4196_s25 + $0x3b0] sm:$0xff] %vm287_vm0, %v2514_v58  ;;  %v2451_v7 = vmax.f32 %v2323_v42, 0.0  ;;  %v2515_v8 = vmax.f32 %v2387_v59, 0.0  ;;  %v1864_v10 = vadd.f32 %v3127_v4, %v542_v56  ;;  %2576 = vst.msk [vmem:[%s4196_s25 + $0x1a0] sm:$0xff] %vm287_vm0, %v2448_v62  ;;  %v1798_v20 = vadd.f32 %v1467_v11, %v476_v60  ;;  %v3297_v30 = vld [vmem:[#allocation9] ss:$0 sm:$0xff] }
 0x1e7   : > { %2640 = vst.msk [vmem:[%s4196_s25 + $0x3a0] sm:$0xff] %vm287_vm0, %v2512_v63  ;;  %v2449_v15 = vmax.f32 %v2321_v0, 0.0  ;;  %v2513_v16 = vmax.f32 %v2385_v1, 0.0  ;;  %v2120_v19 = vld [vmem:[#allocation2 + $0x3d0] sm:$0xff]  ;;  %v1862_v21 = vadd.f32 %v1723_v12, %v540_v61  ;;  %v2191_v24 = vmul.f32 %v4450_v2, %v2056_v18  ;;  %1929 = vst.msk [vmem:[#allocation2 + $0x1f0] sm:$0xff] %vm287_vm0, %v1800_v9 }
 0x1e8   : > { %2579 = vst.msk [vmem:[%s4196_s25 + $0x1b8] sm:$0xff] %vm287_vm0, %v2451_v7  ;;  %2643 = vst.msk [vmem:[%s4196_s25 + $0x3b8] sm:$0xff] %vm287_vm0, %v2515_v8  ;;  %v2255_v25 = vmul.f32 %v4450_v2, %v2120_v19  ;;  %v2054_v26 = vld [vmem:[#allocation2 + $0x1c0] sm:$0xff]  ;;  %v1801_v28 = vadd.f32 %v3064_v22, %v479_v5  ;;  %v1865_v29 = vadd.f32 %v3128_v23, %v543_v6 }
 0x1e9   : > { %v2118_v27 = vld [vmem:[#allocation2 + $0x3c0] sm:$0xff]  ;;  %1993 = vst.msk [vmem:[#allocation2 + $0x3f0] sm:$0xff] %vm287_vm0, %v1864_v10  ;;  %2577 = vst.msk [vmem:[%s4196_s25 + $0x1a8] sm:$0xff] %vm287_vm0, %v2449_v15  ;;  %v2189_v34 = vmul.f32 %v4742_v33, %v2054_v26  ;;  %v2057_v35 = vld [vmem:[#allocation2 + $0x1d8] sm:$0xff]  ;;  %v1799_v37 = vadd.f32 %v1470_v31, %v477_v13  ;;  %v1863_v38 = vadd.f32 %v1726_v32, %v541_v14 }
 0x1ea   : > { %2641 = vst.msk [vmem:[%s4196_s25 + $0x3a8] sm:$0xff] %vm287_vm0, %v2513_v16  ;;  %v2253_v2 = vmul.f32 %v4742_v33, %v2118_v27  ;;  %v2121_v36 = vld [vmem:[#allocation2 + $0x3d8] sm:$0xff]  ;;  %1927 = vst.msk [vmem:[#allocation2 + $0x1e0] sm:$0xff] %vm287_vm0, %v1798_v20  ;;  %v2326_v39 = vadd.f32 %v4464_v17, %v2191_v24  ;;  %v2390_v40 = vadd.f32 %v4464_v17, %v2255_v25  ;;  %v2055_v44 = vld [vmem:[#allocation2 + $0x1c8] sm:$0xff] }
 0x1eb   : > { %1991 = vst.msk [vmem:[#allocation2 + $0x3e0] sm:$0xff] %vm287_vm0, %v1862_v21  ;;  %v2192_v41 = vmul.f32 %v4742_v33, %v2057_v35  ;;  %v2256_v43 = vmul.f32 %v4742_v33, %v2121_v36  ;;  %v2119_v45 = vld [vmem:[#allocation2 + $0x3c8] sm:$0xff]  ;;  %1930 = vst.msk [vmem:[#allocation2 + $0x1f8] sm:$0xff] %vm287_vm0, %v1801_v28  ;;  %v2324_v46 = vadd.f32 %v3297_v30, %v2189_v34 }
 0x1ec   : > { %1994 = vst.msk [vmem:[#allocation2 + $0x3f8] sm:$0xff] %vm287_vm0, %v1865_v29  ;;  %v2388_v47 = vadd.f32 %v3297_v30, %v2253_v2  ;;  %v2190_v48 = vmul.f32 %v4742_v33, %v2055_v44  ;;  %v2254_v17 = vmul.f32 %v4742_v33, %v2119_v45  ;;  %1928 = vst.msk [vmem:[#allocation2 + $0x1e8] sm:$0xff] %vm287_vm0, %v1799_v37  ;;  %v2454_v49 = vmax.f32 %v2326_v39, 0.0 }
 0x1ed   : > { %1992 = vst.msk [vmem:[#allocation2 + $0x3e8] sm:$0xff] %vm287_vm0, %v1863_v38  ;;  %v2518_v50 = vmax.f32 %v2390_v40, 0.0  ;;  %v2327_v51 = vadd.f32 %v3297_v30, %v2192_v41  ;;  %v2391_v52 = vadd.f32 %v3297_v30, %v2256_v43  ;;  %v2452_v53 = vmax.f32 %v2324_v46, 0.0 }
 0x1ee   : > { %v2516_v54 = vmax.f32 %v2388_v47, 0.0  ;;  %v2325_v55 = vadd.f32 %v3297_v30, %v2190_v48  ;;  %v2389_v56 = vadd.f32 %v3297_v30, %v2254_v17  ;;  %2582 = vst.msk [vmem:[%s4196_s25 + $0x1d0] sm:$0xff] %vm287_vm0, %v2454_v49  ;;  %v2060_v60 = vld [vmem:[#allocation2 + $0x1f0] sm:$0xff] }
 0x1ef   : > { %2646 = vst.msk [vmem:[%s4196_s25 + $0x3d0] sm:$0xff] %vm287_vm0, %v2518_v50  ;;  %v2455_v57 = vmax.f32 %v2327_v51, 0.0  ;;  %v2519_v58 = vmax.f32 %v2391_v52, 0.0  ;;  %2580 = vst.msk [vmem:[%s4196_s25 + $0x1c0] sm:$0xff] %vm287_vm0, %v2452_v53  ;;  %v2195_v62 = vmul.f32 %v4742_v33, %v2060_v60 }
 0x1f0   : > { %2644 = vst.msk [vmem:[%s4196_s25 + $0x3c0] sm:$0xff] %vm287_vm0, %v2516_v54  ;;  %v2453_v42 = vmax.f32 %v2325_v55, 0.0  ;;  %v2517_v59 = vmax.f32 %v2389_v56, 0.0  ;;  %v2124_v61 = vld [vmem:[#allocation2 + $0x3f0] sm:$0xff] }
 0x1f1   : > { %2583 = vst.msk [vmem:[%s4196_s25 + $0x1d8] sm:$0xff] %vm287_vm0, %v2455_v57  ;;  %2647 = vst.msk [vmem:[%s4196_s25 + $0x3d8] sm:$0xff] %vm287_vm0, %v2519_v58  ;;  %v2259_v63 = vmul.f32 %v4742_v33, %v2124_v61  ;;  %v2058_v0 = vld [vmem:[#allocation2 + $0x1e0] sm:$0xff]  ;;  %v2330_v7 = vadd.f32 %v3297_v30, %v2195_v62 }
 0x1f2   : > { %v2122_v1 = vld [vmem:[#allocation2 + $0x3e0] sm:$0xff]  ;;  %2581 = vst.msk [vmem:[%s4196_s25 + $0x1c8] sm:$0xff] %vm287_vm0, %v2453_v42  ;;  %2645 = vst.msk [vmem:[%s4196_s25 + $0x3c8] sm:$0xff] %vm287_vm0, %v2517_v59  ;;  %v2193_v3 = vmul.f32 %v4742_v33, %v2058_v0  ;;  %v2061_v5 = vld [vmem:[#allocation2 + $0x1f8] sm:$0xff] }
 0x1f3   : > { %v2257_v4 = vmul.f32 %v4742_v33, %v2122_v1  ;;  %v2125_v6 = vld [vmem:[#allocation2 + $0x3f8] sm:$0xff]  ;;  %v2394_v8 = vadd.f32 %v3297_v30, %v2259_v63  ;;  %v2196_v9 = vmul.f32 %v4742_v33, %v2061_v5  ;;  %v2059_v11 = vld [vmem:[#allocation2 + $0x1e8] sm:$0xff]  ;;  %v2458_v18 = vmax.f32 %v2330_v7, 0.0 }
 0x1f4   : > { %v2260_v10 = vmul.f32 %v4742_v33, %v2125_v6  ;;  %v2123_v12 = vld [vmem:[#allocation2 + $0x3e8] sm:$0xff]  ;;  %v2328_v13 = vadd.f32 %v3297_v30, %v2193_v3  ;;  %v2194_v15 = vmul.f32 %v4742_v33, %v2059_v11 }
 0x1f5   : > { %v2392_v14 = vadd.f32 %v3297_v30, %v2257_v4  ;;  %v2258_v16 = vmul.f32 %v4742_v33, %v2123_v12  ;;  %v2522_v19 = vmax.f32 %v2394_v8, 0.0  ;;  %v2331_v20 = vadd.f32 %v3297_v30, %v2196_v9  ;;  %2586 = vst.msk [vmem:[%s4196_s25 + $0x1f0] sm:$0xff] %vm287_vm0, %v2458_v18 }
 0x1f6   : > { %v2395_v21 = vadd.f32 %v3297_v30, %v2260_v10  ;;  %v2456_v22 = vmax.f32 %v2328_v13, 0.0  ;;  %v2329_v24 = vadd.f32 %v3297_v30, %v2194_v15 }
 0x1f7   : > { %v2520_v23 = vmax.f32 %v2392_v14, 0.0  ;;  %v2393_v25 = vadd.f32 %v3297_v30, %v2258_v16  ;;  %2650 = vst.msk [vmem:[%s4196_s25 + $0x3f0] sm:$0xff] %vm287_vm0, %v2522_v19  ;;  %v2459_v26 = vmax.f32 %v2331_v20, 0.0 }
 0x1f8   : > { %v2523_v27 = vmax.f32 %v2395_v21, 0.0  ;;  %2584 = vst.msk [vmem:[%s4196_s25 + $0x1e0] sm:$0xff] %vm287_vm0, %v2456_v22  ;;  %v2457_v28 = vmax.f32 %v2329_v24, 0.0 }
 0x1f9   : > { %2648 = vst.msk [vmem:[%s4196_s25 + $0x3e0] sm:$0xff] %vm287_vm0, %v2520_v23  ;;  %v2521_v29 = vmax.f32 %v2393_v25, 0.0  ;;  %2587 = vst.msk [vmem:[%s4196_s25 + $0x1f8] sm:$0xff] %vm287_vm0, %v2459_v26 }
 0x1fa   : > { %2651 = vst.msk [vmem:[%s4196_s25 + $0x3f8] sm:$0xff] %vm287_vm0, %v2523_v27  ;;  %2585 = vst.msk [vmem:[%s4196_s25 + $0x1e8] sm:$0xff] %vm287_vm0, %v2457_v28 }
 0x1fb   : > { %2649 = vst.msk [vmem:[%s4196_s25 + $0x3e8] sm:$0xff] %vm287_vm0, %v2521_v29 }
 0x1fc   : > { %3425 = shalt.err (!%p3422_p0)
}
 0x1fd   : > { %s3426_s13 = scalar_lea.hbm %s4791_s24, 16384  ;;  %s3430_s28 = scalar_lea.hbm %s4858_s4, 32768 }
 0x1fe   : > { %p3427_p4 = scmp.ne.s32.totalorder %s4791_s24, %s3426_s13  ;;  %p3431_p12 = scmp.lt.u32.totalorder %s4791_s24, %s4858_s4 }
 0x1ff   : > { %p3432_p1 = scmp.lt.u32.totalorder %s3430_s28, %s3426_s13  ;;  %p3434_p13 = scmp.lt.u32.totalorder %s3426_s13, %s4791_s24 }
 0x200   : > { %p3428_p2 = pnand %p3427_p4, %p3694_p10 }
 0x201   : > { %p3433_p11 = por %p3432_p1, %p3431_p12 }
 0x202   : > { %p3429_p8 = pneg %p3428_p2 }
 0x203   : > { %p3435_p6 = por %p3434_p13, %p3433_p11 }
 0x205   : > { %p3436_p3 = pnand %p3435_p6, %p3429_p8 }
 0x207   : > { %3439 = shalt.err (!%p3436_p3)
}
 0x208   : > { %s3512_s25 = smov 128   ;;  %s3513_s27 = smov 8  }
 0x209   : > { %3145 = dma.vmem_to_hbm [thread:$0]  (%p3694_p10), %s4793_s5, 16384, %s4791_s24, %s2653_s6, %s3512_s25, %s3512_s25, %s3513_s27  }
 0x20a PF: > { %s4878_s18 = sld [smem:[#allocation16_spill]]  ;;  %s2681_s7 = sand.u32 1, %s3482_s15  }
 0x20b   : > { %p4880_p7 = scmp.ge.s32.totalorder %s3502_s20, 2  ;;  %s2682_s26 = scalar_lea.sflag [#allocation5], %s2681_s7 }
 0x210   : > { %p4879_p5 = scmp.ne.s32.totalorder %s4878_s18, 0 }
 0x212   : > { %p3162_p9 = pnand %p4880_p7, %p4879_p5 }
 0x214   : > { %3477 = dma.done.wait (!%p3162_p9), %s2682_s26, 16384  }
 0x215   : > { %3479 = vsyncadd (!%p3162_p9), %s2682_s26, 4294950912  ;;  %s22_s20 = sadd.s32 1, %s3502_s20   ;;  %s4881_s15 = smov %s3486_s16 }
 0x216   : > { %p19_p0 = scmp.ge.s32.totalorder %s22_s20, 4   ;;  %s4882_s16 = smov %s3490_s17 }
 0x217   : > { %s4883_s17 = smov %s3706_s22  ;;  %s4884_s18 = smov %s3498_s19 }
 0x218   : > { %s4885_s19 = smov %s4887_s11  ;;  %21 = sbr.rel (!%p19_p0) target bundleno = 8 (0x8), region = 102 }
 0x21f   :  { %2687 = vsyncpa [#allocation4], 1 }
 0x220   :  { %2689 = vsyncpa [#allocation4 + $0x1], 1 }
 0x221   :  { %2690 = vsyncpa [#allocation7], 1 }
 0x222   :  { %2691 = vsyncpa [#allocation10], 1 }
 0x223   :  { %2692 = vsyncpa [#allocation5], 1 }
 0x224   :  { %2694 = vsyncpa [#allocation5 + $0x1], 1 }

</bundles_post_ra>
